<compile_context>
chip_gen: v7x
topology: tpu7x:2x2x1
jax: 0.10.0
libtpu: 0.0.40
codegen_flags: <defaults>
</compile_context>

<pallas_src>
import functools

import jax
import jax.numpy as jnp
from jax.experimental import pallas as pl
from jax.experimental.pallas import tpu as pltpu


def _fused_forward_kernel(
    # VMEM inputs
    gidx_ref, cidx_ref, dense_ref,
    gtab_ref, ctab_ref,
    dw1_ref, db1_ref, dw2_ref, db2_ref,
    ow1_ref, ob1_ref, ow2_ref, ob2_ref,
    ow3_ref, ob3_ref, ow4_ref, ob4_ref,
    ow5_ref, ob5_ref,
    # output (lane-dense, logit in column 0)
    out_ref,
    *, tb, bag_len, compute_dtype,
):
    f32 = jnp.float32

    # ---- sum-pooled EmbeddingBag per table: pooled = counts(tb,E) @ table(E,D)
    def pool(idx_ref, tab_ref):
        num_tables, vocab, _ = tab_ref.shape
        e_iota = jax.lax.broadcasted_iota(jnp.int32, (tb, vocab), 1)
        pooled = []
        for t in range(num_tables):
            idx_t = idx_ref[t]                                  # (tb, L) int32
            counts = jnp.zeros((tb, vocab), f32)
            for l in range(bag_len):                            # L is small
                counts = counts + (idx_t[:, l:l + 1] == e_iota).astype(f32)
            pooled.append(jnp.dot(counts.astype(compute_dtype), tab_ref[t],
                                  preferred_element_type=f32))  # (tb, D) f32
        return pooled

    pooled_gpu = pool(gidx_ref, gtab_ref)
    pooled_cpu = pool(cidx_ref, ctab_ref)

    # ---- dense_arch: Linear -> ReLU -> Linear (hidden width padded to 128)
    x = dense_ref[...].astype(compute_dtype)
    h = jnp.dot(x, dw1_ref[...], preferred_element_type=f32) + db1_ref[...]
    h = jnp.maximum(h, 0.0).astype(compute_dtype)
    d_emb = jnp.dot(h, dw2_ref[...], preferred_element_type=f32) + db2_ref[...]

    # ---- over_arch layer 1: the concat [gpu | cpu | dense] is folded into the
    # ---- matmul by splitting W1 into per-chunk row slabs (no lane re-layout).
    feats = pooled_gpu + pooled_cpu + [d_emb]
    acc = None
    off = 0
    for f in feats:
        d = f.shape[-1]
        part = jnp.dot(f.astype(compute_dtype), ow1_ref[off:off + d, :],
                       preferred_element_type=f32)
        acc = part if acc is None else acc + part
        off += d
    z = jnp.maximum(acc + ob1_ref[...], 0.0).astype(compute_dtype)

    # ---- over_arch layers 2-4 (Linear -> ReLU), lane-dense 128-wide
    for w_ref, b_ref in ((ow2_ref, ob2_ref), (ow3_ref, ob3_ref), (ow4_ref, ob4_ref)):
        z = jnp.dot(z, w_ref[...], preferred_element_type=f32) + b_ref[...]
        z = jnp.maximum(z, 0.0).astype(compute_dtype)

    # ---- final layer, zero-padded to 128 output lanes (real logit = column 0)
    logits = jnp.dot(z, ow5_ref[...], preferred_element_type=f32) + ob5_ref[...]
    out_ref[...] = logits.astype(out_ref.dtype)


def mixed_sharded_snn_forward(params, dense_features, gpu_sparse_idx, cpu_sparse_idx,
                              *, batch_tile=128, compute_dtype=jnp.bfloat16):
    B, dense_dim = dense_features.shape
    Tg, Eg, Dg = params["gpu_tables"].shape
    Tc, Ec, Dc = params["cpu_tables"].shape
    L = gpu_sparse_idx.shape[-1]
    assert cpu_sparse_idx.shape[-1] == L

    over_dim = params["dense_w1"].shape[1]
    in_feature_dim = Tg * Dg + Tc * Dc + Dg
    assert params["over"][0].shape[0] == in_feature_dim

    # ---- batch tiling (ragged batches are zero-padded; padded rows sliced off)
    tb = min(batch_tile, B)
    if tb < B:
        tb = max(8, (tb // 8) * 8)
    nb = pl.cdiv(B, tb)
    Bp = nb * tb
    if Bp != B:
        pad = Bp - B
        dense_features = jnp.pad(dense_features, ((0, pad), (0, 0)))
        gpu_sparse_idx = jnp.pad(gpu_sparse_idx, ((0, 0), (0, pad), (0, 0)))
        cpu_sparse_idx = jnp.pad(cpu_sparse_idx, ((0, 0), (0, pad), (0, 0)))

    gidx = gpu_sparse_idx.astype(jnp.int32)   # (Tg, Bp, L)
    cidx = cpu_sparse_idx.astype(jnp.int32)   # (Tc, Bp, L)

    # ---- lane-dense weight padding (hidden widths -> 128) + bf16 cast -------
    op = max(128, ((over_dim + 127) // 128) * 128)   # padded hidden width
    out_pad = 128                                    # padded logit width

    def pad_w(w, rows, cols):
        return jnp.pad(w, ((0, rows - w.shape[0]), (0, cols - w.shape[1])))

    cd = compute_dtype
    ov = params["over"]
    dw1 = pad_w(params["dense_w1"], dense_dim, op).astype(cd)
    db1 = pad_w(params["dense_b1"], 1, op).astype(jnp.float32)
    dw2 = pad_w(params["dense_w2"], op, Dg).astype(cd)
    db2 = params["dense_b2"].astype(jnp.float32)
    ow1 = pad_w(ov[0], in_feature_dim, op).astype(cd)
    ob1 = pad_w(ov[1], 1, op).astype(jnp.float32)
    ow2 = pad_w(ov[2], op, op).astype(cd)
    ob2 = pad_w(ov[3], 1, op).astype(jnp.float32)
    ow3 = pad_w(ov[4], op, op).astype(cd)
    ob3 = pad_w(ov[5], 1, op).astype(jnp.float32)
    ow4 = pad_w(ov[6], op, op).astype(cd)
    ob4 = pad_w(ov[7], 1, op).astype(jnp.float32)
    ow5 = pad_w(ov[8], op, out_pad).astype(cd)
    ob5 = pad_w(ov[9], 1, out_pad).astype(jnp.float32)

    gtab = params["gpu_tables"].astype(cd)
    ctab = params["cpu_tables"].astype(cd)

    mlp = [dw1, db1, dw2, db2, ow1, ob1, ow2, ob2, ow3, ob3, ow4, ob4, ow5, ob5]

    kernel = functools.partial(_fused_forward_kernel,
                               tb=tb, bag_len=L, compute_dtype=cd)

    def full(shape):
        return pl.BlockSpec(shape, lambda i: (0,) * len(shape))

    in_specs = [
        pl.BlockSpec((Tg, tb, L), lambda i: (0, i, 0)),
        pl.BlockSpec((Tc, tb, L), lambda i: (0, i, 0)),
        pl.BlockSpec((tb, dense_dim), lambda i: (i, 0)),
        full(gtab.shape),
        full(ctab.shape),
    ] + [full(w.shape) for w in mlp]

    grid_spec = pltpu.PrefetchScalarGridSpec(
        num_scalar_prefetch=0,
        grid=(nb,),
        in_specs=in_specs,
        out_specs=pl.BlockSpec((tb, out_pad), lambda i: (i, 0)),
    )

    out = pl.pallas_call(
        kernel,
        out_shape=jax.ShapeDtypeStruct((Bp, out_pad), dense_features.dtype),
        grid_spec=grid_spec,
        compiler_params=pltpu.CompilerParams(
            dimension_semantics=("parallel",),
            vmem_limit_bytes=64 * 1024 * 1024),
    )(gidx, cidx, dense_features, gtab, ctab, *mlp)

    return out[:B, :1]


# ---------------- pure-JAX reference (for correctness check) ----------------
def _reference_forward(params, dense_features, gpu_idx, cpu_idx):
    def bag(idx, tables):  # idx (T,B,L), tables (T,E,D) -> (T,B,D), sum pooled
        return jnp.stack([tables[t][idx[t]].sum(axis=1) for t in range(idx.shape[0])], axis=0)

    g = bag(gpu_idx, params["gpu_tables"])
    c = bag(cpu_idx, params["cpu_tables"])
    d = jnp.maximum(dense_features @ params["dense_w1"] + params["dense_b1"], 0.0)
    d = d @ params["dense_w2"] + params["dense_b2"]
    B = dense_features.shape[0]
    z = jnp.concatenate(
        [jnp.transpose(g, (1, 0, 2)).reshape(B, -1),
         jnp.transpose(c, (1, 0, 2)).reshape(B, -1), d], axis=1)
    ws = params["over"]
    for i in range(0, 8, 2):
        z = jnp.maximum(z @ ws[i] + ws[i + 1], 0.0)
    return z @ ws[8] + ws[9]


if __name__ == "__main__":
    key = jax.random.PRNGKey(0)
    B = 8
    dense_features_dim = 16
    over_dim = 32
    gpu_num_tables, gpu_num_embeddings, gpu_embedding_dim = 2, 32, 16
    cpu_num_tables, cpu_num_embeddings, cpu_embedding_dim = 2, 64, 16
    bag_len = 4
    world_size = 1  # hvd.size()

    in_feature_dim = (gpu_embedding_dim * gpu_num_tables * world_size
                      + cpu_embedding_dim * cpu_num_tables
                      + gpu_embedding_dim)

    keys = jax.random.split(key, 20)

    def init(k, shape, scale=0.05):
        return (scale * jax.random.normal(k, shape)).astype(jnp.float32)

    params = {
        "gpu_tables": init(keys[0], (gpu_num_tables, gpu_num_embeddings, gpu_embedding_dim)),
        "cpu_tables": init(keys[1], (cpu_num_tables, cpu_num_embeddings, cpu_embedding_dim)),
        "dense_w1": init(keys[2], (dense_features_dim, over_dim)),
        "dense_b1": init(keys[3], (1, over_dim)),
        "dense_w2": init(keys[4], (over_dim, gpu_embedding_dim)),
        "dense_b2": init(keys[5], (1, gpu_embedding_dim)),
        "over": [
            init(keys[6], (in_feature_dim, over_dim)), init(keys[7], (1, over_dim)),
            init(keys[8], (over_dim, over_dim)),       init(keys[9], (1, over_dim)),
            init(keys[10], (over_dim, over_dim)),      init(keys[11], (1, over_dim)),
            init(keys[12], (over_dim, over_dim)),      init(keys[13], (1, over_dim)),
            init(keys[14], (over_dim, 1)),             init(keys[15], (1, 1)),
        ],
    }

    dense_features = init(keys[16], (B, dense_features_dim), scale=1.0)
    gpu_sparse_idx = jax.random.randint(
        keys[17], (gpu_num_tables, B, bag_len), 0, gpu_num_embeddings, dtype=jnp.int32)
    cpu_sparse_idx = jax.random.randint(
        keys[18], (cpu_num_tables, B, bag_len), 0, cpu_num_embeddings, dtype=jnp.int32)

    fwd = jax.jit(mixed_sharded_snn_forward)
    logits = fwd(params, dense_features, gpu_sparse_idx, cpu_sparse_idx)
    jax.block_until_ready(logits)
    assert logits.shape == (B, 1) and logits.dtype == jnp.float32

    ref = _reference_forward(params, dense_features, gpu_sparse_idx, cpu_sparse_idx)
    # bf16 matmul operands (f32 accumulation) -> compare with a bf16-level tolerance
    assert jnp.allclose(logits, ref, atol=1e-2, rtol=1e-2), (logits, ref)

    print("KERNEL_OK")
</pallas_src>

<mosaic_0001>
module attributes {stable_mosaic.version = 11 : i64} {
  func.func @_fused_forward_kernel(%arg0: i32, %arg1: memref<2x8x4xi32, #tpu.memory_space<vmem>>, %arg2: memref<2x8x4xi32, #tpu.memory_space<vmem>>, %arg3: memref<8x16xf32, #tpu.memory_space<vmem>>, %arg4: memref<2x32x16xbf16, #tpu.memory_space<vmem>>, %arg5: memref<2x64x16xbf16, #tpu.memory_space<vmem>>, %arg6: memref<16x128xbf16, #tpu.memory_space<vmem>>, %arg7: memref<1x128xf32, #tpu.memory_space<vmem>>, %arg8: memref<128x16xbf16, #tpu.memory_space<vmem>>, %arg9: memref<1x16xf32, #tpu.memory_space<vmem>>, %arg10: memref<80x128xbf16, #tpu.memory_space<vmem>>, %arg11: memref<1x128xf32, #tpu.memory_space<vmem>>, %arg12: memref<128x128xbf16, #tpu.memory_space<vmem>>, %arg13: memref<1x128xf32, #tpu.memory_space<vmem>>, %arg14: memref<128x128xbf16, #tpu.memory_space<vmem>>, %arg15: memref<1x128xf32, #tpu.memory_space<vmem>>, %arg16: memref<128x128xbf16, #tpu.memory_space<vmem>>, %arg17: memref<1x128xf32, #tpu.memory_space<vmem>>, %arg18: memref<128x128xbf16, #tpu.memory_space<vmem>>, %arg19: memref<1x128xf32, #tpu.memory_space<vmem>>, %arg20: memref<8x128xf32, #tpu.memory_space<vmem>>) attributes {dimension_semantics = [#tpu.dimension_semantics<parallel>], iteration_bounds = array<i64: 1>, scalar_prefetch = 0 : i64, scratch_operands = 0 : i64, tpu.core_type = #tpu.core_type<tc>, window_params = [{transform_indices = @transform_0, window_bounds = array<i64: 2, 8, 4>}, {transform_indices = @transform_1, window_bounds = array<i64: 2, 8, 4>}, {transform_indices = @transform_2, window_bounds = array<i64: 8, 16>}, {pipeline_mode = #tpu.pipeline_mode<synchronous>, transform_indices = @transform_3, window_bounds = array<i64: 2, 32, 16>}, {pipeline_mode = #tpu.pipeline_mode<synchronous>, transform_indices = @transform_4, window_bounds = array<i64: 2, 64, 16>}, {pipeline_mode = #tpu.pipeline_mode<synchronous>, transform_indices = @transform_5, window_bounds = array<i64: 16, 128>}, {pipeline_mode = #tpu.pipeline_mode<synchronous>, transform_indices = @transform_6, window_bounds = array<i64: 1, 128>}, {pipeline_mode = #tpu.pipeline_mode<synchronous>, transform_indices = @transform_7, window_bounds = array<i64: 128, 16>}, {pipeline_mode = #tpu.pipeline_mode<synchronous>, transform_indices = @transform_8, window_bounds = array<i64: 1, 16>}, {pipeline_mode = #tpu.pipeline_mode<synchronous>, transform_indices = @transform_9, window_bounds = array<i64: 80, 128>}, {pipeline_mode = #tpu.pipeline_mode<synchronous>, transform_indices = @transform_10, window_bounds = array<i64: 1, 128>}, {pipeline_mode = #tpu.pipeline_mode<synchronous>, transform_indices = @transform_11, window_bounds = array<i64: 128, 128>}, {pipeline_mode = #tpu.pipeline_mode<synchronous>, transform_indices = @transform_12, window_bounds = array<i64: 1, 128>}, {pipeline_mode = #tpu.pipeline_mode<synchronous>, transform_indices = @transform_13, window_bounds = array<i64: 128, 128>}, {pipeline_mode = #tpu.pipeline_mode<synchronous>, transform_indices = @transform_14, window_bounds = array<i64: 1, 128>}, {pipeline_mode = #tpu.pipeline_mode<synchronous>, transform_indices = @transform_15, window_bounds = array<i64: 128, 128>}, {pipeline_mode = #tpu.pipeline_mode<synchronous>, transform_indices = @transform_16, window_bounds = array<i64: 1, 128>}, {pipeline_mode = #tpu.pipeline_mode<synchronous>, transform_indices = @transform_17, window_bounds = array<i64: 128, 128>}, {pipeline_mode = #tpu.pipeline_mode<synchronous>, transform_indices = @transform_18, window_bounds = array<i64: 1, 128>}, {transform_indices = @transform_19, window_bounds = array<i64: 8, 128>}]} {
    %0 = tpu.iota {dimensions = array<i32: 1>} : vector<8x32xi32>
    %c0 = arith.constant 0 : index
    %c0_0 = arith.constant 0 : index
    %c0_1 = arith.constant 0 : index
    %1 = vector.load %arg1[%c0, %c0_0, %c0_1] : memref<2x8x4xi32, #tpu.memory_space<vmem>>, vector<1x8x4xi32>
    %2 = vector.shape_cast %1 : vector<1x8x4xi32> to vector<8x4xi32>
    %cst = arith.constant 0.000000e+00 : f32
    %3 = vector.broadcast %cst : f32 to vector<8x32xf32>
    %4 = vector.extract_strided_slice %2 {offsets = [0, 0], sizes = [8, 1], strides = [1, 1]} : vector<8x4xi32> to vector<8x1xi32>
    %5 = vector.broadcast %4 : vector<8x1xi32> to vector<8x32xi32>
    %6 = arith.cmpi eq, %5, %0 : vector<8x32xi32>
    %7 = arith.extui %6 : vector<8x32xi1> to vector<8x32xi32>
    %8 = arith.sitofp %7 : vector<8x32xi32> to vector<8x32xf32>
    %9 = arith.addf %3, %8 : vector<8x32xf32>
    %10 = vector.extract_strided_slice %2 {offsets = [0, 1], sizes = [8, 1], strides = [1, 1]} : vector<8x4xi32> to vector<8x1xi32>
    %11 = vector.broadcast %10 : vector<8x1xi32> to vector<8x32xi32>
    %12 = arith.cmpi eq, %11, %0 : vector<8x32xi32>
    %13 = arith.extui %12 : vector<8x32xi1> to vector<8x32xi32>
    %14 = arith.sitofp %13 : vector<8x32xi32> to vector<8x32xf32>
    %15 = arith.addf %9, %14 : vector<8x32xf32>
    %16 = vector.extract_strided_slice %2 {offsets = [0, 2], sizes = [8, 1], strides = [1, 1]} : vector<8x4xi32> to vector<8x1xi32>
    %17 = vector.broadcast %16 : vector<8x1xi32> to vector<8x32xi32>
    %18 = arith.cmpi eq, %17, %0 : vector<8x32xi32>
    %19 = arith.extui %18 : vector<8x32xi1> to vector<8x32xi32>
    %20 = arith.sitofp %19 : vector<8x32xi32> to vector<8x32xf32>
    %21 = arith.addf %15, %20 : vector<8x32xf32>
    %22 = vector.extract_strided_slice %2 {offsets = [0, 3], sizes = [8, 1], strides = [1, 1]} : vector<8x4xi32> to vector<8x1xi32>
    %23 = vector.broadcast %22 : vector<8x1xi32> to vector<8x32xi32>
    %24 = arith.cmpi eq, %23, %0 : vector<8x32xi32>
    %25 = arith.extui %24 : vector<8x32xi1> to vector<8x32xi32>
    %26 = arith.sitofp %25 : vector<8x32xi32> to vector<8x32xf32>
    %27 = arith.addf %21, %26 : vector<8x32xf32>
    %28 = arith.truncf %27 : vector<8x32xf32> to vector<8x32xbf16>
    %c0_2 = arith.constant 0 : index
    %c0_3 = arith.constant 0 : index
    %c0_4 = arith.constant 0 : index
    %29 = vector.load %arg4[%c0_2, %c0_3, %c0_4] : memref<2x32x16xbf16, #tpu.memory_space<vmem>>, vector<1x32x16xbf16>
    %30 = vector.shape_cast %29 : vector<1x32x16xbf16> to vector<32x16xbf16>
    %cst_5 = arith.constant dense<0.000000e+00> : vector<8x16xf32>
    %31 = tpu.matmul %28, %30, %cst_5 {dimension_numbers = #tpu.dot_dimension_numbers<[1], [0], [0], [1], [0, 0, 1, 1], [], []>} : vector<8x32xbf16>, vector<32x16xbf16>, vector<8x16xf32> -> vector<8x16xf32>
    %c1 = arith.constant 1 : index
    %c0_6 = arith.constant 0 : index
    %c0_7 = arith.constant 0 : index
    %32 = vector.load %arg1[%c1, %c0_6, %c0_7] : memref<2x8x4xi32, #tpu.memory_space<vmem>>, vector<1x8x4xi32>
    %33 = vector.shape_cast %32 : vector<1x8x4xi32> to vector<8x4xi32>
    %cst_8 = arith.constant 0.000000e+00 : f32
    %34 = vector.broadcast %cst_8 : f32 to vector<8x32xf32>
    %35 = vector.extract_strided_slice %33 {offsets = [0, 0], sizes = [8, 1], strides = [1, 1]} : vector<8x4xi32> to vector<8x1xi32>
    %36 = vector.broadcast %35 : vector<8x1xi32> to vector<8x32xi32>
    %37 = arith.cmpi eq, %36, %0 : vector<8x32xi32>
    %38 = arith.extui %37 : vector<8x32xi1> to vector<8x32xi32>
    %39 = arith.sitofp %38 : vector<8x32xi32> to vector<8x32xf32>
    %40 = arith.addf %34, %39 : vector<8x32xf32>
    %41 = vector.extract_strided_slice %33 {offsets = [0, 1], sizes = [8, 1], strides = [1, 1]} : vector<8x4xi32> to vector<8x1xi32>
    %42 = vector.broadcast %41 : vector<8x1xi32> to vector<8x32xi32>
    %43 = arith.cmpi eq, %42, %0 : vector<8x32xi32>
    %44 = arith.extui %43 : vector<8x32xi1> to vector<8x32xi32>
    %45 = arith.sitofp %44 : vector<8x32xi32> to vector<8x32xf32>
    %46 = arith.addf %40, %45 : vector<8x32xf32>
    %47 = vector.extract_strided_slice %33 {offsets = [0, 2], sizes = [8, 1], strides = [1, 1]} : vector<8x4xi32> to vector<8x1xi32>
    %48 = vector.broadcast %47 : vector<8x1xi32> to vector<8x32xi32>
    %49 = arith.cmpi eq, %48, %0 : vector<8x32xi32>
    %50 = arith.extui %49 : vector<8x32xi1> to vector<8x32xi32>
    %51 = arith.sitofp %50 : vector<8x32xi32> to vector<8x32xf32>
    %52 = arith.addf %46, %51 : vector<8x32xf32>
    %53 = vector.extract_strided_slice %33 {offsets = [0, 3], sizes = [8, 1], strides = [1, 1]} : vector<8x4xi32> to vector<8x1xi32>
    %54 = vector.broadcast %53 : vector<8x1xi32> to vector<8x32xi32>
    %55 = arith.cmpi eq, %54, %0 : vector<8x32xi32>
    %56 = arith.extui %55 : vector<8x32xi1> to vector<8x32xi32>
    %57 = arith.sitofp %56 : vector<8x32xi32> to vector<8x32xf32>
    %58 = arith.addf %52, %57 : vector<8x32xf32>
    %59 = arith.truncf %58 : vector<8x32xf32> to vector<8x32xbf16>
    %c1_9 = arith.constant 1 : index
    %c0_10 = arith.constant 0 : index
    %c0_11 = arith.constant 0 : index
    %60 = vector.load %arg4[%c1_9, %c0_10, %c0_11] : memref<2x32x16xbf16, #tpu.memory_space<vmem>>, vector<1x32x16xbf16>
    %61 = vector.shape_cast %60 : vector<1x32x16xbf16> to vector<32x16xbf16>
    %cst_12 = arith.constant dense<0.000000e+00> : vector<8x16xf32>
    %62 = tpu.matmul %59, %61, %cst_12 {dimension_numbers = #tpu.dot_dimension_numbers<[1], [0], [0], [1], [0, 0, 1, 1], [], []>} : vector<8x32xbf16>, vector<32x16xbf16>, vector<8x16xf32> -> vector<8x16xf32>
    %63 = tpu.iota {dimensions = array<i32: 1>} : vector<8x64xi32>
    %c0_13 = arith.constant 0 : index
    %c0_14 = arith.constant 0 : index
    %c0_15 = arith.constant 0 : index
    %64 = vector.load %arg2[%c0_13, %c0_14, %c0_15] : memref<2x8x4xi32, #tpu.memory_space<vmem>>, vector<1x8x4xi32>
    %65 = vector.shape_cast %64 : vector<1x8x4xi32> to vector<8x4xi32>
    %cst_16 = arith.constant 0.000000e+00 : f32
    %66 = vector.broadcast %cst_16 : f32 to vector<8x64xf32>
    %67 = vector.extract_strided_slice %65 {offsets = [0, 0], sizes = [8, 1], strides = [1, 1]} : vector<8x4xi32> to vector<8x1xi32>
    %68 = vector.broadcast %67 : vector<8x1xi32> to vector<8x64xi32>
    %69 = arith.cmpi eq, %68, %63 : vector<8x64xi32>
    %70 = arith.extui %69 : vector<8x64xi1> to vector<8x64xi32>
    %71 = arith.sitofp %70 : vector<8x64xi32> to vector<8x64xf32>
    %72 = arith.addf %66, %71 : vector<8x64xf32>
    %73 = vector.extract_strided_slice %65 {offsets = [0, 1], sizes = [8, 1], strides = [1, 1]} : vector<8x4xi32> to vector<8x1xi32>
    %74 = vector.broadcast %73 : vector<8x1xi32> to vector<8x64xi32>
    %75 = arith.cmpi eq, %74, %63 : vector<8x64xi32>
    %76 = arith.extui %75 : vector<8x64xi1> to vector<8x64xi32>
    %77 = arith.sitofp %76 : vector<8x64xi32> to vector<8x64xf32>
    %78 = arith.addf %72, %77 : vector<8x64xf32>
    %79 = vector.extract_strided_slice %65 {offsets = [0, 2], sizes = [8, 1], strides = [1, 1]} : vector<8x4xi32> to vector<8x1xi32>
    %80 = vector.broadcast %79 : vector<8x1xi32> to vector<8x64xi32>
    %81 = arith.cmpi eq, %80, %63 : vector<8x64xi32>
    %82 = arith.extui %81 : vector<8x64xi1> to vector<8x64xi32>
    %83 = arith.sitofp %82 : vector<8x64xi32> to vector<8x64xf32>
    %84 = arith.addf %78, %83 : vector<8x64xf32>
    %85 = vector.extract_strided_slice %65 {offsets = [0, 3], sizes = [8, 1], strides = [1, 1]} : vector<8x4xi32> to vector<8x1xi32>
    %86 = vector.broadcast %85 : vector<8x1xi32> to vector<8x64xi32>
    %87 = arith.cmpi eq, %86, %63 : vector<8x64xi32>
    %88 = arith.extui %87 : vector<8x64xi1> to vector<8x64xi32>
    %89 = arith.sitofp %88 : vector<8x64xi32> to vector<8x64xf32>
    %90 = arith.addf %84, %89 : vector<8x64xf32>
    %91 = arith.truncf %90 : vector<8x64xf32> to vector<8x64xbf16>
    %c0_17 = arith.constant 0 : index
    %c0_18 = arith.constant 0 : index
    %c0_19 = arith.constant 0 : index
    %92 = vector.load %arg5[%c0_17, %c0_18, %c0_19] : memref<2x64x16xbf16, #tpu.memory_space<vmem>>, vector<1x64x16xbf16>
    %93 = vector.shape_cast %92 : vector<1x64x16xbf16> to vector<64x16xbf16>
    %cst_20 = arith.constant dense<0.000000e+00> : vector<8x16xf32>
    %94 = tpu.matmul %91, %93, %cst_20 {dimension_numbers = #tpu.dot_dimension_numbers<[1], [0], [0], [1], [0, 0, 1, 1], [], []>} : vector<8x64xbf16>, vector<64x16xbf16>, vector<8x16xf32> -> vector<8x16xf32>
    %c1_21 = arith.constant 1 : index
    %c0_22 = arith.constant 0 : index
    %c0_23 = arith.constant 0 : index
    %95 = vector.load %arg2[%c1_21, %c0_22, %c0_23] : memref<2x8x4xi32, #tpu.memory_space<vmem>>, vector<1x8x4xi32>
    %96 = vector.shape_cast %95 : vector<1x8x4xi32> to vector<8x4xi32>
    %cst_24 = arith.constant 0.000000e+00 : f32
    %97 = vector.broadcast %cst_24 : f32 to vector<8x64xf32>
    %98 = vector.extract_strided_slice %96 {offsets = [0, 0], sizes = [8, 1], strides = [1, 1]} : vector<8x4xi32> to vector<8x1xi32>
    %99 = vector.broadcast %98 : vector<8x1xi32> to vector<8x64xi32>
    %100 = arith.cmpi eq, %99, %63 : vector<8x64xi32>
    %101 = arith.extui %100 : vector<8x64xi1> to vector<8x64xi32>
    %102 = arith.sitofp %101 : vector<8x64xi32> to vector<8x64xf32>
    %103 = arith.addf %97, %102 : vector<8x64xf32>
    %104 = vector.extract_strided_slice %96 {offsets = [0, 1], sizes = [8, 1], strides = [1, 1]} : vector<8x4xi32> to vector<8x1xi32>
    %105 = vector.broadcast %104 : vector<8x1xi32> to vector<8x64xi32>
    %106 = arith.cmpi eq, %105, %63 : vector<8x64xi32>
    %107 = arith.extui %106 : vector<8x64xi1> to vector<8x64xi32>
    %108 = arith.sitofp %107 : vector<8x64xi32> to vector<8x64xf32>
    %109 = arith.addf %103, %108 : vector<8x64xf32>
    %110 = vector.extract_strided_slice %96 {offsets = [0, 2], sizes = [8, 1], strides = [1, 1]} : vector<8x4xi32> to vector<8x1xi32>
    %111 = vector.broadcast %110 : vector<8x1xi32> to vector<8x64xi32>
    %112 = arith.cmpi eq, %111, %63 : vector<8x64xi32>
    %113 = arith.extui %112 : vector<8x64xi1> to vector<8x64xi32>
    %114 = arith.sitofp %113 : vector<8x64xi32> to vector<8x64xf32>
    %115 = arith.addf %109, %114 : vector<8x64xf32>
    %116 = vector.extract_strided_slice %96 {offsets = [0, 3], sizes = [8, 1], strides = [1, 1]} : vector<8x4xi32> to vector<8x1xi32>
    %117 = vector.broadcast %116 : vector<8x1xi32> to vector<8x64xi32>
    %118 = arith.cmpi eq, %117, %63 : vector<8x64xi32>
    %119 = arith.extui %118 : vector<8x64xi1> to vector<8x64xi32>
    %120 = arith.sitofp %119 : vector<8x64xi32> to vector<8x64xf32>
    %121 = arith.addf %115, %120 : vector<8x64xf32>
    %122 = arith.truncf %121 : vector<8x64xf32> to vector<8x64xbf16>
    %c1_25 = arith.constant 1 : index
    %c0_26 = arith.constant 0 : index
    %c0_27 = arith.constant 0 : index
    %123 = vector.load %arg5[%c1_25, %c0_26, %c0_27] : memref<2x64x16xbf16, #tpu.memory_space<vmem>>, vector<1x64x16xbf16>
    %124 = vector.shape_cast %123 : vector<1x64x16xbf16> to vector<64x16xbf16>
    %cst_28 = arith.constant dense<0.000000e+00> : vector<8x16xf32>
    %125 = tpu.matmul %122, %124, %cst_28 {dimension_numbers = #tpu.dot_dimension_numbers<[1], [0], [0], [1], [0, 0, 1, 1], [], []>} : vector<8x64xbf16>, vector<64x16xbf16>, vector<8x16xf32> -> vector<8x16xf32>
    %c0_29 = arith.constant 0 : index
    %c0_30 = arith.constant 0 : index
    %126 = vector.load %arg3[%c0_29, %c0_30] : memref<8x16xf32, #tpu.memory_space<vmem>>, vector<8x16xf32>
    %127 = arith.truncf %126 : vector<8x16xf32> to vector<8x16xbf16>
    %c0_31 = arith.constant 0 : index
    %c0_32 = arith.constant 0 : index
    %128 = vector.load %arg6[%c0_31, %c0_32] : memref<16x128xbf16, #tpu.memory_space<vmem>>, vector<16x128xbf16>
    %cst_33 = arith.constant dense<0.000000e+00> : vector<8x128xf32>
    %129 = tpu.matmul %127, %128, %cst_33 {dimension_numbers = #tpu.dot_dimension_numbers<[1], [0], [0], [1], [0, 0, 1, 1], [], []>} : vector<8x16xbf16>, vector<16x128xbf16>, vector<8x128xf32> -> vector<8x128xf32>
    %c0_34 = arith.constant 0 : index
    %c0_35 = arith.constant 0 : index
    %130 = vector.load %arg7[%c0_34, %c0_35] : memref<1x128xf32, #tpu.memory_space<vmem>>, vector<1x128xf32>
    %131 = vector.broadcast %130 : vector<1x128xf32> to vector<8x128xf32>
    %132 = arith.addf %129, %131 : vector<8x128xf32>
    %cst_36 = arith.constant 0.000000e+00 : f32
    %133 = vector.broadcast %cst_36 : f32 to vector<8x128xf32>
    %134 = arith.maximumf %132, %133 : vector<8x128xf32>
    %135 = arith.truncf %134 : vector<8x128xf32> to vector<8x128xbf16>
    %c0_37 = arith.constant 0 : index
    %c0_38 = arith.constant 0 : index
    %136 = vector.load %arg8[%c0_37, %c0_38] : memref<128x16xbf16, #tpu.memory_space<vmem>>, vector<128x16xbf16>
    %cst_39 = arith.constant dense<0.000000e+00> : vector<8x16xf32>
    %137 = tpu.matmul %135, %136, %cst_39 {dimension_numbers = #tpu.dot_dimension_numbers<[1], [0], [0], [1], [0, 0, 1, 1], [], []>} : vector<8x128xbf16>, vector<128x16xbf16>, vector<8x16xf32> -> vector<8x16xf32>
    %c0_40 = arith.constant 0 : index
    %c0_41 = arith.constant 0 : index
    %138 = vector.load %arg9[%c0_40, %c0_41] : memref<1x16xf32, #tpu.memory_space<vmem>>, vector<1x16xf32>
    %139 = vector.broadcast %138 : vector<1x16xf32> to vector<8x16xf32>
    %140 = arith.addf %137, %139 : vector<8x16xf32>
    %141 = arith.truncf %31 : vector<8x16xf32> to vector<8x16xbf16>
    %c0_42 = arith.constant 0 : index
    %c0_43 = arith.constant 0 : index
    %142 = vector.load %arg10[%c0_42, %c0_43] : memref<80x128xbf16, #tpu.memory_space<vmem>>, vector<16x128xbf16>
    %cst_44 = arith.constant dense<0.000000e+00> : vector<8x128xf32>
    %143 = tpu.matmul %141, %142, %cst_44 {dimension_numbers = #tpu.dot_dimension_numbers<[1], [0], [0], [1], [0, 0, 1, 1], [], []>} : vector<8x16xbf16>, vector<16x128xbf16>, vector<8x128xf32> -> vector<8x128xf32>
    %144 = arith.truncf %62 : vector<8x16xf32> to vector<8x16xbf16>
    %c16 = arith.constant 16 : index
    %c0_45 = arith.constant 0 : index
    %145 = vector.load %arg10[%c16, %c0_45] : memref<80x128xbf16, #tpu.memory_space<vmem>>, vector<16x128xbf16>
    %cst_46 = arith.constant dense<0.000000e+00> : vector<8x128xf32>
    %146 = tpu.matmul %144, %145, %cst_46 {dimension_numbers = #tpu.dot_dimension_numbers<[1], [0], [0], [1], [0, 0, 1, 1], [], []>} : vector<8x16xbf16>, vector<16x128xbf16>, vector<8x128xf32> -> vector<8x128xf32>
    %147 = arith.addf %143, %146 : vector<8x128xf32>
    %148 = arith.truncf %94 : vector<8x16xf32> to vector<8x16xbf16>
    %c32 = arith.constant 32 : index
    %c0_47 = arith.constant 0 : index
    %149 = vector.load %arg10[%c32, %c0_47] : memref<80x128xbf16, #tpu.memory_space<vmem>>, vector<16x128xbf16>
    %cst_48 = arith.constant dense<0.000000e+00> : vector<8x128xf32>
    %150 = tpu.matmul %148, %149, %cst_48 {dimension_numbers = #tpu.dot_dimension_numbers<[1], [0], [0], [1], [0, 0, 1, 1], [], []>} : vector<8x16xbf16>, vector<16x128xbf16>, vector<8x128xf32> -> vector<8x128xf32>
    %151 = arith.addf %147, %150 : vector<8x128xf32>
    %152 = arith.truncf %125 : vector<8x16xf32> to vector<8x16xbf16>
    %c48 = arith.constant 48 : index
    %c0_49 = arith.constant 0 : index
    %153 = vector.load %arg10[%c48, %c0_49] : memref<80x128xbf16, #tpu.memory_space<vmem>>, vector<16x128xbf16>
    %cst_50 = arith.constant dense<0.000000e+00> : vector<8x128xf32>
    %154 = tpu.matmul %152, %153, %cst_50 {dimension_numbers = #tpu.dot_dimension_numbers<[1], [0], [0], [1], [0, 0, 1, 1], [], []>} : vector<8x16xbf16>, vector<16x128xbf16>, vector<8x128xf32> -> vector<8x128xf32>
    %155 = arith.addf %151, %154 : vector<8x128xf32>
    %156 = arith.truncf %140 : vector<8x16xf32> to vector<8x16xbf16>
    %c64 = arith.constant 64 : index
    %c0_51 = arith.constant 0 : index
    %157 = vector.load %arg10[%c64, %c0_51] : memref<80x128xbf16, #tpu.memory_space<vmem>>, vector<16x128xbf16>
    %cst_52 = arith.constant dense<0.000000e+00> : vector<8x128xf32>
    %158 = tpu.matmul %156, %157, %cst_52 {dimension_numbers = #tpu.dot_dimension_numbers<[1], [0], [0], [1], [0, 0, 1, 1], [], []>} : vector<8x16xbf16>, vector<16x128xbf16>, vector<8x128xf32> -> vector<8x128xf32>
    %159 = arith.addf %155, %158 : vector<8x128xf32>
    %c0_53 = arith.constant 0 : index
    %c0_54 = arith.constant 0 : index
    %160 = vector.load %arg11[%c0_53, %c0_54] : memref<1x128xf32, #tpu.memory_space<vmem>>, vector<1x128xf32>
    %161 = vector.broadcast %160 : vector<1x128xf32> to vector<8x128xf32>
    %162 = arith.addf %159, %161 : vector<8x128xf32>
    %cst_55 = arith.constant 0.000000e+00 : f32
    %163 = vector.broadcast %cst_55 : f32 to vector<8x128xf32>
    %164 = arith.maximumf %162, %163 : vector<8x128xf32>
    %165 = arith.truncf %164 : vector<8x128xf32> to vector<8x128xbf16>
    %c0_56 = arith.constant 0 : index
    %c0_57 = arith.constant 0 : index
    %166 = vector.load %arg12[%c0_56, %c0_57] : memref<128x128xbf16, #tpu.memory_space<vmem>>, vector<128x128xbf16>
    %cst_58 = arith.constant dense<0.000000e+00> : vector<8x128xf32>
    %167 = tpu.matmul %165, %166, %cst_58 {dimension_numbers = #tpu.dot_dimension_numbers<[1], [0], [0], [1], [0, 0, 1, 1], [], []>} : vector<8x128xbf16>, vector<128x128xbf16>, vector<8x128xf32> -> vector<8x128xf32>
    %c0_59 = arith.constant 0 : index
    %c0_60 = arith.constant 0 : index
    %168 = vector.load %arg13[%c0_59, %c0_60] : memref<1x128xf32, #tpu.memory_space<vmem>>, vector<1x128xf32>
    %169 = vector.broadcast %168 : vector<1x128xf32> to vector<8x128xf32>
    %170 = arith.addf %167, %169 : vector<8x128xf32>
    %cst_61 = arith.constant 0.000000e+00 : f32
    %171 = vector.broadcast %cst_61 : f32 to vector<8x128xf32>
    %172 = arith.maximumf %170, %171 : vector<8x128xf32>
    %173 = arith.truncf %172 : vector<8x128xf32> to vector<8x128xbf16>
    %c0_62 = arith.constant 0 : index
    %c0_63 = arith.constant 0 : index
    %174 = vector.load %arg14[%c0_62, %c0_63] : memref<128x128xbf16, #tpu.memory_space<vmem>>, vector<128x128xbf16>
    %cst_64 = arith.constant dense<0.000000e+00> : vector<8x128xf32>
    %175 = tpu.matmul %173, %174, %cst_64 {dimension_numbers = #tpu.dot_dimension_numbers<[1], [0], [0], [1], [0, 0, 1, 1], [], []>} : vector<8x128xbf16>, vector<128x128xbf16>, vector<8x128xf32> -> vector<8x128xf32>
    %c0_65 = arith.constant 0 : index
    %c0_66 = arith.constant 0 : index
    %176 = vector.load %arg15[%c0_65, %c0_66] : memref<1x128xf32, #tpu.memory_space<vmem>>, vector<1x128xf32>
    %177 = vector.broadcast %176 : vector<1x128xf32> to vector<8x128xf32>
    %178 = arith.addf %175, %177 : vector<8x128xf32>
    %cst_67 = arith.constant 0.000000e+00 : f32
    %179 = vector.broadcast %cst_67 : f32 to vector<8x128xf32>
    %180 = arith.maximumf %178, %179 : vector<8x128xf32>
    %181 = arith.truncf %180 : vector<8x128xf32> to vector<8x128xbf16>
    %c0_68 = arith.constant 0 : index
    %c0_69 = arith.constant 0 : index
    %182 = vector.load %arg16[%c0_68, %c0_69] : memref<128x128xbf16, #tpu.memory_space<vmem>>, vector<128x128xbf16>
    %cst_70 = arith.constant dense<0.000000e+00> : vector<8x128xf32>
    %183 = tpu.matmul %181, %182, %cst_70 {dimension_numbers = #tpu.dot_dimension_numbers<[1], [0], [0], [1], [0, 0, 1, 1], [], []>} : vector<8x128xbf16>, vector<128x128xbf16>, vector<8x128xf32> -> vector<8x128xf32>
    %c0_71 = arith.constant 0 : index
    %c0_72 = arith.constant 0 : index
    %184 = vector.load %arg17[%c0_71, %c0_72] : memref<1x128xf32, #tpu.memory_space<vmem>>, vector<1x128xf32>
    %185 = vector.broadcast %184 : vector<1x128xf32> to vector<8x128xf32>
    %186 = arith.addf %183, %185 : vector<8x128xf32>
    %cst_73 = arith.constant 0.000000e+00 : f32
    %187 = vector.broadcast %cst_73 : f32 to vector<8x128xf32>
    %188 = arith.maximumf %186, %187 : vector<8x128xf32>
    %189 = arith.truncf %188 : vector<8x128xf32> to vector<8x128xbf16>
    %c0_74 = arith.constant 0 : index
    %c0_75 = arith.constant 0 : index
    %190 = vector.load %arg18[%c0_74, %c0_75] : memref<128x128xbf16, #tpu.memory_space<vmem>>, vector<128x128xbf16>
    %cst_76 = arith.constant dense<0.000000e+00> : vector<8x128xf32>
    %191 = tpu.matmul %189, %190, %cst_76 {dimension_numbers = #tpu.dot_dimension_numbers<[1], [0], [0], [1], [0, 0, 1, 1], [], []>} : vector<8x128xbf16>, vector<128x128xbf16>, vector<8x128xf32> -> vector<8x128xf32>
    %c0_77 = arith.constant 0 : index
    %c0_78 = arith.constant 0 : index
    %192 = vector.load %arg19[%c0_77, %c0_78] : memref<1x128xf32, #tpu.memory_space<vmem>>, vector<1x128xf32>
    %193 = vector.broadcast %192 : vector<1x128xf32> to vector<8x128xf32>
    %194 = arith.addf %191, %193 : vector<8x128xf32>
    %c0_79 = arith.constant 0 : index
    %c0_80 = arith.constant 0 : index
    %195 = vector.load %arg20[%c0_79, %c0_80] : memref<8x128xf32, #tpu.memory_space<vmem>>, vector<8x128xf32>
    tpu.vector_store %arg20[%c0_79, %c0_80], %194 {strides = array<i32>} : memref<8x128xf32, #tpu.memory_space<vmem>>, vector<8x128xf32>,
    return
  }
  func.func @transform_0(%arg0: i32) -> (i32, i32, i32) {
    %c0_i32 = arith.constant 0 : i32
    %c0_i32_0 = arith.constant 0 : i32
    %c0_i32_1 = arith.constant 0 : i32
    return %c0_i32, %arg0, %c0_i32_0 : i32, i32, i32
  }
  func.func @transform_1(%arg0: i32) -> (i32, i32, i32) {
    %c0_i32 = arith.constant 0 : i32
    %c0_i32_0 = arith.constant 0 : i32
    %c0_i32_1 = arith.constant 0 : i32
    return %c0_i32, %arg0, %c0_i32_0 : i32, i32, i32
  }
  func.func @transform_2(%arg0: i32) -> (i32, i32) {
    %c0_i32 = arith.constant 0 : i32
    %c0_i32_0 = arith.constant 0 : i32
    return %arg0, %c0_i32 : i32, i32
  }
  func.func @transform_3(%arg0: i32) -> (i32, i32, i32) {
    %c0_i32 = arith.constant 0 : i32
    %c0_i32_0 = arith.constant 0 : i32
    %c0_i32_1 = arith.constant 0 : i32
    %c0_i32_2 = arith.constant 0 : i32
    return %c0_i32, %c0_i32_0, %c0_i32_1 : i32, i32, i32
  }
  func.func @transform_4(%arg0: i32) -> (i32, i32, i32) {
    %c0_i32 = arith.constant 0 : i32
    %c0_i32_0 = arith.constant 0 : i32
    %c0_i32_1 = arith.constant 0 : i32
    %c0_i32_2 = arith.constant 0 : i32
    return %c0_i32, %c0_i32_0, %c0_i32_1 : i32, i32, i32
  }
  func.func @transform_5(%arg0: i32) -> (i32, i32) {
    %c0_i32 = arith.constant 0 : i32
    %c0_i32_0 = arith.constant 0 : i32
    %c0_i32_1 = arith.constant 0 : i32
    return %c0_i32, %c0_i32_0 : i32, i32
  }
  func.func @transform_6(%arg0: i32) -> (i32, i32) {
    %c0_i32 = arith.constant 0 : i32
    %c0_i32_0 = arith.constant 0 : i32
    %c0_i32_1 = arith.constant 0 : i32
    return %c0_i32, %c0_i32_0 : i32, i32
  }
  func.func @transform_7(%arg0: i32) -> (i32, i32) {
    %c0_i32 = arith.constant 0 : i32
    %c0_i32_0 = arith.constant 0 : i32
    %c0_i32_1 = arith.constant 0 : i32
    return %c0_i32, %c0_i32_0 : i32, i32
  }
  func.func @transform_8(%arg0: i32) -> (i32, i32) {
    %c0_i32 = arith.constant 0 : i32
    %c0_i32_0 = arith.constant 0 : i32
    %c0_i32_1 = arith.constant 0 : i32
    return %c0_i32, %c0_i32_0 : i32, i32
  }
  func.func @transform_9(%arg0: i32) -> (i32, i32) {
    %c0_i32 = arith.constant 0 : i32
    %c0_i32_0 = arith.constant 0 : i32
    %c0_i32_1 = arith.constant 0 : i32
    return %c0_i32, %c0_i32_0 : i32, i32
  }
  func.func @transform_10(%arg0: i32) -> (i32, i32) {
    %c0_i32 = arith.constant 0 : i32
    %c0_i32_0 = arith.constant 0 : i32
    %c0_i32_1 = arith.constant 0 : i32
    return %c0_i32, %c0_i32_0 : i32, i32
  }
  func.func @transform_11(%arg0: i32) -> (i32, i32) {
    %c0_i32 = arith.constant 0 : i32
    %c0_i32_0 = arith.constant 0 : i32
    %c0_i32_1 = arith.constant 0 : i32
    return %c0_i32, %c0_i32_0 : i32, i32
  }
  func.func @transform_12(%arg0: i32) -> (i32, i32) {
    %c0_i32 = arith.constant 0 : i32
    %c0_i32_0 = arith.constant 0 : i32
    %c0_i32_1 = arith.constant 0 : i32
    return %c0_i32, %c0_i32_0 : i32, i32
  }
  func.func @transform_13(%arg0: i32) -> (i32, i32) {
    %c0_i32 = arith.constant 0 : i32
    %c0_i32_0 = arith.constant 0 : i32
    %c0_i32_1 = arith.constant 0 : i32
    return %c0_i32, %c0_i32_0 : i32, i32
  }
  func.func @transform_14(%arg0: i32) -> (i32, i32) {
    %c0_i32 = arith.constant 0 : i32
    %c0_i32_0 = arith.constant 0 : i32
    %c0_i32_1 = arith.constant 0 : i32
    return %c0_i32, %c0_i32_0 : i32, i32
  }
  func.func @transform_15(%arg0: i32) -> (i32, i32) {
    %c0_i32 = arith.constant 0 : i32
    %c0_i32_0 = arith.constant 0 : i32
    %c0_i32_1 = arith.constant 0 : i32
    return %c0_i32, %c0_i32_0 : i32, i32
  }
  func.func @transform_16(%arg0: i32) -> (i32, i32) {
    %c0_i32 = arith.constant 0 : i32
    %c0_i32_0 = arith.constant 0 : i32
    %c0_i32_1 = arith.constant 0 : i32
    return %c0_i32, %c0_i32_0 : i32, i32
  }
  func.func @transform_17(%arg0: i32) -> (i32, i32) {
    %c0_i32 = arith.constant 0 : i32
    %c0_i32_0 = arith.constant 0 : i32
    %c0_i32_1 = arith.constant 0 : i32
    return %c0_i32, %c0_i32_0 : i32, i32
  }
  func.func @transform_18(%arg0: i32) -> (i32, i32) {
    %c0_i32 = arith.constant 0 : i32
    %c0_i32_0 = arith.constant 0 : i32
    %c0_i32_1 = arith.constant 0 : i32
    return %c0_i32, %c0_i32_0 : i32, i32
  }
  func.func @transform_19(%arg0: i32) -> (i32, i32) {
    %c0_i32 = arith.constant 0 : i32
    %c0_i32_0 = arith.constant 0 : i32
    return %arg0, %c0_i32 : i32, i32
  }
}

</mosaic_0001>

<bundles_post_ra>
// kernel: mixed_sharded_snn_forward.1
= control target key start
LH: loop header
LB: loop body
LE: loop exit
PB: predicated region body
PF: predicated region fallthrough
CT: control target
= control target key end

     0   :  { %s3106_s0 = inlined_call_operand.hbm [shape: s32[2,8,4], index: 0, kind: input, shape index: {}]   ;;  %s3107_s1 = inlined_call_operand.hbm [shape: s32[2,8,4], index: 1, kind: input, shape index: {}]   ;;  %s3108_s2 = inlined_call_operand.hbm [shape: f32[8,16], index: 2, kind: input, shape index: {}]   ;;  %s3109_s3 = inlined_call_operand.hbm [shape: bf16[2,32,16], index: 3, kind: input, shape index: {}]   ;;  %s3110_s4 = inlined_call_operand.hbm [shape: bf16[2,64,16], index: 4, kind: input, shape index: {}]   ;;  %s3111_s5 = inlined_call_operand.hbm [shape: bf16[16,128], index: 5, kind: input, shape index: {}]   ;;  %s3112_s6 = inlined_call_operand.hbm [shape: f32[1,128], index: 6, kind: input, shape index: {}]   ;;  %s3113_s7 = inlined_call_operand.hbm [shape: bf16[128,16], index: 7, kind: input, shape index: {}]   ;;  %s3114_s8 = inlined_call_operand.hbm [shape: f32[1,16], index: 8, kind: input, shape index: {}]   ;;  %s3115_s9 = inlined_call_operand.hbm [shape: bf16[80,128], index: 9, kind: input, shape index: {}]   ;;  %s3116_s10 = inlined_call_operand.hbm [shape: f32[1,128], index: 10, kind: input, shape index: {}]   ;;  %s3117_s11 = inlined_call_operand.hbm [shape: bf16[128,128], index: 11, kind: input, shape index: {}]   ;;  %s3118_s12 = inlined_call_operand.hbm [shape: f32[1,128], index: 12, kind: input, shape index: {}]   ;;  %s3119_s13 = inlined_call_operand.hbm [shape: bf16[128,128], index: 13, kind: input, shape index: {}]   ;;  %s3120_s14 = inlined_call_operand.hbm [shape: f32[1,128], index: 14, kind: input, shape index: {}]   ;;  %s3121_s15 = inlined_call_operand.hbm [shape: bf16[128,128], index: 15, kind: input, shape index: {}]   ;;  %s3122_s16 = inlined_call_operand.hbm [shape: f32[1,128], index: 16, kind: input, shape index: {}]   ;;  %s3123_s17 = inlined_call_operand.hbm [shape: bf16[128,128], index: 17, kind: input, shape index: {}]   ;;  %s3124_s18 = inlined_call_operand.hbm [shape: f32[1,128], index: 18, kind: input, shape index: {}]   ;;  %s3125_s19 = inlined_call_operand.hbm [shape: f32[8,128], index: 19, kind: output, shape index: {}]  }
   0x1   :  { %3134 = sst [smem:[#allocation44_spill]] %s3106_s0 }
   0x2   :  { %3135 = sst [smem:[#allocation45_spill]] %s3107_s1 }
   0x3   :  { %3136 = sst [smem:[#allocation46_spill]] %s3108_s2 }
   0x4   :  { %3137 = sst [smem:[#allocation47_spill]] %s3109_s3 }
   0x5   :  { %3138 = sst [smem:[#allocation48_spill]] %s3124_s18 }
   0x6   :  { %3139 = sst [smem:[#allocation49_spill]] %s3125_s19 }
   0x7   :  { %24 = vsyncpa [#allocation3], 0 }
   0x8   :  { %25 = vsyncpa [#allocation6], 0 }
   0x9   :  { %26 = vsyncpa [#allocation9], 0 }
   0xa   :  { %27 = vsyncpa [#allocation12], 0 }
   0xb   :  { %28 = vsyncpa [#allocation15], 0 }
   0xc   :  { %29 = vsyncpa [#allocation18], 0 }
   0xd   :  { %30 = vsyncpa [#allocation21], 0 }
   0xe   :  { %31 = vsyncpa [#allocation24], 0 }
   0xf   :  { %32 = vsyncpa [#allocation27], 0 }
  0x10   :  { %33 = vsyncpa [#allocation30], 0 }
  0x11   :  { %34 = vsyncpa [#allocation4], 0  ;;  %s2529_s0 = smov [#allocation5]   ;;  %s2530_s20 = smov [#allocation8]  }
  0x12   :  { %s52_s30 = sshll.u32 %s2529_s0, 4  ;;  %s74_s21 = sshll.u32 %s2530_s20, 4  ;;  %s53_s30 = int_to_ptr.vmem [resolvable:$true] %s52_s30  ;;  %s2659_s21 = int_to_ptr.vmem [resolvable:$true] %s74_s21 }
  0x13   :  { %s3140_s2 = sld [smem:[#allocation45_spill]] }
  0x19   :  { %s2067_s23 = scalar_lea.hbm %s3140_s2, 256 }
  0x1a   :  { %p2068_p0 = scmp.ne.s32.totalorder %s3140_s2, %s2067_s23  ;;  %p2071_p1 = scmp.lt.u32.totalorder %s2067_s23, %s3140_s2 }
  0x1c   :  { %p2073_p2 = pnand %p2071_p1, %p2068_p0 }
  0x1e   :  { %2076 = shalt.err (!%p2073_p2)
}
  0x1f   :  { %s2077_s27 = scalar_lea.vmem %s53_s30, 256  ;;  %p2082_p4 = scmp.lt.s32.totalorder %s53_s30, %s53_s30 }
  0x20   :  { %p2078_p3 = scmp.ne.s32.totalorder %s53_s30, %s2077_s27  ;;  %p2083_p5 = scmp.lt.s32.totalorder %s2077_s27, %s2077_s27 }
  0x22   :  { %p2084_p6 = por %p2083_p5, %p2082_p4 }
  0x24   :  { %p2085_p7 = pnand %p2084_p6, %p2078_p3 }
  0x26   :  { %2088 = shalt.err (!%p2085_p7)
}
  0x27   :  { %s3131_s28 = smov 128   ;;  %s3132_s29 = smov 8  }
  0x28   :  { %58 = dma.hbm_to_vmem [thread:$0]  %s3140_s2, 256, %s53_s30, [#allocation6], %s3131_s28, %s3131_s28, %s3132_s29  }
  0x29   :  { %s3141_s23 = sld [smem:[#allocation47_spill]] }
  0x2f   :  { %s2089_s24 = scalar_lea.hbm %s3141_s23, 512 }
  0x30   :  { %p2090_p8 = scmp.ne.s32.totalorder %s3141_s23, %s2089_s24  ;;  %p2093_p9 = scmp.lt.u32.totalorder %s2089_s24, %s3141_s23 }
  0x32   :  { %p2095_p10 = pnand %p2093_p9, %p2090_p8 }
  0x34   :  { %2098 = shalt.err (!%p2095_p10)
}
  0x35   :  { %s2099_s19 = scalar_lea.vmem %s2659_s21, 512  ;;  %p2104_p12 = scmp.lt.s32.totalorder %s2659_s21, %s2659_s21 }
  0x36   :  { %p2100_p11 = scmp.ne.s32.totalorder %s2659_s21, %s2099_s19  ;;  %p2105_p13 = scmp.lt.s32.totalorder %s2099_s19, %s2099_s19 }
  0x38   :  { %p2106_p0 = por %p2105_p13, %p2104_p12 }
  0x3a   :  { %p2107_p1 = pnand %p2106_p0, %p2100_p11 }
  0x3c   :  { %2110 = shalt.err (!%p2107_p1)
}
  0x3d   :  { %s2533_s30 = smov 64   ;;  %s2534_s2 = smov 4  }
  0x3e   :  { %80 = dma.hbm_to_vmem [thread:$0]  %s3141_s23, 512, %s2659_s21, [#allocation9], %s2533_s30, %s2533_s30, %s2534_s2  }
  0x3f   :  { %s2535_s1 = smov [#allocation11]   ;;  %s2536_s24 = smov [#allocation14]  }
  0x40   :  { %s98_s22 = sshll.u32 %s2535_s1, 4  ;;  %s120_s25 = sshll.u32 %s2536_s24, 4  ;;  %s99_s22 = int_to_ptr.vmem [resolvable:$true] %s98_s22  ;;  %s2696_s25 = int_to_ptr.vmem [resolvable:$true] %s120_s25 }
  0x41   :  { %s2111_s26 = scalar_lea.hbm %s3111_s5, 128 }
  0x42   :  { %p2112_p2 = scmp.ne.s32.totalorder %s3111_s5, %s2111_s26  ;;  %p2115_p3 = scmp.lt.u32.totalorder %s2111_s26, %s3111_s5 }
  0x44   :  { %p2117_p4 = pnand %p2115_p3, %p2112_p2 }
  0x46   :  { %2120 = shalt.err (!%p2117_p4)
}
  0x47   :  { %s2121_s21 = scalar_lea.vmem %s99_s22, 128  ;;  %p2126_p6 = scmp.lt.s32.totalorder %s99_s22, %s99_s22 }
  0x48   :  { %p2122_p5 = scmp.ne.s32.totalorder %s99_s22, %s2121_s21  ;;  %p2127_p7 = scmp.lt.s32.totalorder %s2121_s21, %s2121_s21 }
  0x4a   :  { %p2128_p8 = por %p2127_p7, %p2126_p6 }
  0x4c   :  { %p2129_p9 = pnand %p2128_p8, %p2122_p5 }
  0x4e   :  { %2132 = shalt.err (!%p2129_p9)
}
  0x4f   :  { %104 = dma.hbm_to_vmem [thread:$0]  %s3111_s5, 128, %s99_s22, [#allocation12], %s2533_s30, %s2533_s30, %s2534_s2  }
  0x50   :  { %s2133_s18 = scalar_lea.hbm %s3113_s7, 1024 }
  0x51   :  { %p2134_p10 = scmp.ne.s32.totalorder %s3113_s7, %s2133_s18  ;;  %p2137_p11 = scmp.lt.u32.totalorder %s2133_s18, %s3113_s7 }
  0x53   :  { %p2139_p12 = pnand %p2137_p11, %p2134_p10 }
  0x55   :  { %2142 = shalt.err (!%p2139_p12)
}
  0x56   :  { %s2143_s3 = scalar_lea.vmem %s2696_s25, 1024  ;;  %p2148_p0 = scmp.lt.s32.totalorder %s2696_s25, %s2696_s25 }
  0x57   :  { %p2144_p13 = scmp.ne.s32.totalorder %s2696_s25, %s2143_s3  ;;  %p2149_p1 = scmp.lt.s32.totalorder %s2143_s3, %s2143_s3 }
  0x59   :  { %p2150_p2 = por %p2149_p1, %p2148_p0 }
  0x5b   :  { %p2151_p3 = pnand %p2150_p2, %p2144_p13 }
  0x5d   :  { %2154 = shalt.err (!%p2151_p3)
}
  0x5e   :  { %126 = dma.hbm_to_vmem [thread:$0]  %s3113_s7, 1024, %s2696_s25, [#allocation15], %s2533_s30, %s2533_s30, %s2534_s2  }
  0x5f   :  { %s2537_s26 = smov [#allocation17]   ;;  %s2538_s21 = smov [#allocation20]  }
  0x60   :  { %s142_s27 = sshll.u32 %s2537_s26, 4  ;;  %s164_s23 = sshll.u32 %s2538_s21, 4  ;;  %s143_s27 = int_to_ptr.vmem [resolvable:$true] %s142_s27  ;;  %s2733_s23 = int_to_ptr.vmem [resolvable:$true] %s164_s23 }
  0x61   :  { %s2155_s20 = scalar_lea.hbm %s3115_s9, 640 }
  0x62   :  { %p2156_p4 = scmp.ne.s32.totalorder %s3115_s9, %s2155_s20  ;;  %p2159_p5 = scmp.lt.u32.totalorder %s2155_s20, %s3115_s9 }
  0x64   :  { %p2161_p6 = pnand %p2159_p5, %p2156_p4 }
  0x66   :  { %2164 = shalt.err (!%p2161_p6)
}
  0x67   :  { %s2165_s7 = scalar_lea.vmem %s143_s27, 640  ;;  %p2170_p8 = scmp.lt.s32.totalorder %s143_s27, %s143_s27 }
  0x68   :  { %p2166_p7 = scmp.ne.s32.totalorder %s143_s27, %s2165_s7  ;;  %p2171_p9 = scmp.lt.s32.totalorder %s2165_s7, %s2165_s7 }
  0x6a   :  { %p2172_p10 = por %p2171_p9, %p2170_p8 }
  0x6c   :  { %p2173_p11 = pnand %p2172_p10, %p2166_p7 }
  0x6e   :  { %2176 = shalt.err (!%p2173_p11)
}
  0x6f   :  { %148 = dma.hbm_to_vmem [thread:$0]  %s3115_s9, 640, %s143_s27, [#allocation18], %s2533_s30, %s2533_s30, %s2534_s2  }
  0x70   :  { %s2177_s22 = scalar_lea.hbm %s3117_s11, 1024 }
  0x71   :  { %p2178_p12 = scmp.ne.s32.totalorder %s3117_s11, %s2177_s22  ;;  %p2181_p13 = scmp.lt.u32.totalorder %s2177_s22, %s3117_s11 }
  0x73   :  { %p2183_p0 = pnand %p2181_p13, %p2178_p12 }
  0x75   :  { %2186 = shalt.err (!%p2183_p0)
}
  0x76   :  { %s2187_s20 = scalar_lea.vmem %s2733_s23, 1024  ;;  %p2192_p2 = scmp.lt.s32.totalorder %s2733_s23, %s2733_s23 }
  0x77   :  { %p2188_p1 = scmp.ne.s32.totalorder %s2733_s23, %s2187_s20  ;;  %p2193_p3 = scmp.lt.s32.totalorder %s2187_s20, %s2187_s20 }
  0x79   :  { %p2194_p4 = por %p2193_p3, %p2192_p2 }
  0x7b   :  { %p2195_p5 = pnand %p2194_p4, %p2188_p1 }
  0x7d   :  { %2198 = shalt.err (!%p2195_p5)
}
  0x7e   :  { %170 = dma.hbm_to_vmem [thread:$0]  %s3117_s11, 1024, %s2733_s23, [#allocation21], %s2533_s30, %s2533_s30, %s2534_s2  }
  0x7f   :  { %s2539_s18 = smov [#allocation23]   ;;  %s2540_s1 = smov [#allocation26]  }
  0x80   :  { %s186_s29 = sshll.u32 %s2539_s18, 4  ;;  %s208_s24 = sshll.u32 %s2540_s1, 4  ;;  %s187_s29 = int_to_ptr.vmem [resolvable:$true] %s186_s29  ;;  %s2770_s24 = int_to_ptr.vmem [resolvable:$true] %s208_s24 }
  0x81   :  { %s2199_s19 = scalar_lea.hbm %s3119_s13, 1024 }
  0x82   :  { %p2200_p6 = scmp.ne.s32.totalorder %s3119_s13, %s2199_s19  ;;  %p2203_p7 = scmp.lt.u32.totalorder %s2199_s19, %s3119_s13 }
  0x84   :  { %p2205_p8 = pnand %p2203_p7, %p2200_p6 }
  0x86   :  { %2208 = shalt.err (!%p2205_p8)
}
  0x87   :  { %s2209_s11 = scalar_lea.vmem %s187_s29, 1024  ;;  %p2214_p10 = scmp.lt.s32.totalorder %s187_s29, %s187_s29 }
  0x88   :  { %p2210_p9 = scmp.ne.s32.totalorder %s187_s29, %s2209_s11  ;;  %p2215_p11 = scmp.lt.s32.totalorder %s2209_s11, %s2209_s11 }
  0x8a   :  { %p2216_p12 = por %p2215_p11, %p2214_p10 }
  0x8c   :  { %p2217_p13 = pnand %p2216_p12, %p2210_p9 }
  0x8e   :  { %2220 = shalt.err (!%p2217_p13)
}
  0x8f   :  { %192 = dma.hbm_to_vmem [thread:$0]  %s3119_s13, 1024, %s187_s29, [#allocation24], %s2533_s30, %s2533_s30, %s2534_s2  }
  0x90   :  { %s2221_s20 = scalar_lea.hbm %s3121_s15, 1024 }
  0x91   :  { %p2222_p0 = scmp.ne.s32.totalorder %s3121_s15, %s2221_s20  ;;  %p2225_p1 = scmp.lt.u32.totalorder %s2221_s20, %s3121_s15 }
  0x93   :  { %p2227_p2 = pnand %p2225_p1, %p2222_p0 }
  0x95   :  { %2230 = shalt.err (!%p2227_p2)
}
  0x96   :  { %s2231_s7 = scalar_lea.vmem %s2770_s24, 1024  ;;  %p2236_p4 = scmp.lt.s32.totalorder %s2770_s24, %s2770_s24 }
  0x97   :  { %p2232_p3 = scmp.ne.s32.totalorder %s2770_s24, %s2231_s7  ;;  %p2237_p5 = scmp.lt.s32.totalorder %s2231_s7, %s2231_s7 }
  0x99   :  { %p2238_p6 = por %p2237_p5, %p2236_p4 }
  0x9b   :  { %p2239_p7 = pnand %p2238_p6, %p2232_p3 }
  0x9d   :  { %2242 = shalt.err (!%p2239_p7)
}
  0x9e   :  { %214 = dma.hbm_to_vmem [thread:$0]  %s3121_s15, 1024, %s2770_s24, [#allocation27], %s2533_s30, %s2533_s30, %s2534_s2  }
  0x9f   :  { %s2541_s25 = smov [#allocation29]   ;;  %s2542_s3 = smov [#allocation2]  }
  0xa0   :  { %s230_s19 = sshll.u32 %s2541_s25, 4  ;;  %s40_s5 = sshll.u32 %s2542_s3, 4  ;;  %s231_s19 = int_to_ptr.vmem [resolvable:$true] %s230_s19  ;;  %s2807_s5 = int_to_ptr.vmem [resolvable:$true] %s40_s5 }
  0xa1   :  { %s2243_s11 = scalar_lea.hbm %s3123_s17, 1024 }
  0xa2   :  { %p2244_p8 = scmp.ne.s32.totalorder %s3123_s17, %s2243_s11  ;;  %p2247_p9 = scmp.lt.u32.totalorder %s2243_s11, %s3123_s17 }
  0xa4   :  { %p2249_p10 = pnand %p2247_p9, %p2244_p8 }
  0xa6   :  { %2252 = shalt.err (!%p2249_p10)
}
  0xa7   :  { %s2253_s15 = scalar_lea.vmem %s231_s19, 1024  ;;  %p2258_p12 = scmp.lt.s32.totalorder %s231_s19, %s231_s19 }
  0xa8   :  { %p2254_p11 = scmp.ne.s32.totalorder %s231_s19, %s2253_s15  ;;  %p2259_p13 = scmp.lt.s32.totalorder %s2253_s15, %s2253_s15 }
  0xaa   :  { %p2260_p0 = por %p2259_p13, %p2258_p12 }
  0xac   :  { %p2261_p1 = pnand %p2260_p0, %p2254_p11 }
  0xae   :  { %2264 = shalt.err (!%p2261_p1)
}
  0xaf   :  { %236 = dma.hbm_to_vmem [thread:$0]  %s3123_s17, 1024, %s231_s19, [#allocation30], %s2533_s30, %s2533_s30, %s2534_s2  }
  0xb0   :  { %s3142_s18 = sld [smem:[#allocation44_spill]] }
  0xb6   :  { %s2265_s1 = scalar_lea.hbm %s3142_s18, 256 }
  0xb7   :  { %p2266_p2 = scmp.ne.s32.totalorder %s3142_s18, %s2265_s1  ;;  %p2269_p3 = scmp.lt.u32.totalorder %s2265_s1, %s3142_s18 }
  0xb9   :  { %p2271_p4 = pnand %p2269_p3, %p2266_p2 }
  0xbb   :  { %2274 = shalt.err (!%p2271_p4)
}
  0xbc   :  { %s2275_s3 = scalar_lea.vmem %s2807_s5, 256  ;;  %p2280_p6 = scmp.lt.s32.totalorder %s2807_s5, %s2807_s5 }
  0xbd   :  { %p2276_p5 = scmp.ne.s32.totalorder %s2807_s5, %s2275_s3  ;;  %p2281_p7 = scmp.lt.s32.totalorder %s2275_s3, %s2275_s3 }
  0xbf   :  { %p2282_p8 = por %p2281_p7, %p2280_p6 }
  0xc1   :  { %p2283_p9 = pnand %p2282_p8, %p2276_p5 }
  0xc3   :  { %2286 = shalt.err (!%p2283_p9)
}
  0xc4   :  { %s3143_s17 = smov 8   ;;  %s3144_s19 = smov 128  }
  0xc5   :  { %46 = dma.hbm_to_vmem [thread:$0]  %s3142_s18, 256, %s2807_s5, [#allocation3], %s3144_s19, %s3144_s19, %s3143_s17  }
  0xc6   :  { %s2543_s11 = smov [#allocation7]   ;;  %s2544_s21 = smov [#allocation10]  }
  0xc7   :  { %s65_s23 = sshll.u32 %s2543_s11, 4  ;;  %s86_s0 = sshll.u32 %s2544_s21, 4  ;;  %s66_s23 = int_to_ptr.vmem [resolvable:$true] %s65_s23  ;;  %s2844_s0 = int_to_ptr.vmem [resolvable:$true] %s86_s0 }
  0xc8   :  { %s3145_s24 = sld [smem:[#allocation46_spill]] }
  0xce   :  { %s2287_s20 = scalar_lea.hbm %s3145_s24, 128 }
  0xcf   :  { %p2288_p10 = scmp.ne.s32.totalorder %s3145_s24, %s2287_s20  ;;  %p2291_p11 = scmp.lt.u32.totalorder %s2287_s20, %s3145_s24 }
  0xd1   :  { %p2293_p12 = pnand %p2291_p11, %p2288_p10 }
  0xd3   :  { %2296 = shalt.err (!%p2293_p12)
}
  0xd4   :  { %s2297_s5 = scalar_lea.vmem %s66_s23, 128  ;;  %p2302_p0 = scmp.lt.s32.totalorder %s66_s23, %s66_s23 }
  0xd5   :  { %p2298_p13 = scmp.ne.s32.totalorder %s66_s23, %s2297_s5  ;;  %p2303_p1 = scmp.lt.s32.totalorder %s2297_s5, %s2297_s5 }
  0xd7   :  { %p2304_p2 = por %p2303_p1, %p2302_p0 }
  0xd9   :  { %p2305_p3 = pnand %p2304_p2, %p2298_p13 }
  0xdb   :  { %2308 = shalt.err (!%p2305_p3)
}
  0xdc   :  { %68 = dma.hbm_to_vmem [thread:$0]  %s3145_s24, 128, %s66_s23, [#allocation6]  }
  0xdd   :  { %s2309_s3 = scalar_lea.hbm %s3110_s4, 1024 }
  0xde   :  { %p2310_p4 = scmp.ne.s32.totalorder %s3110_s4, %s2309_s3  ;;  %p2313_p5 = scmp.lt.u32.totalorder %s2309_s3, %s3110_s4 }
  0xe0   :  { %p2315_p6 = pnand %p2313_p5, %p2310_p4 }
  0xe2   :  { %2318 = shalt.err (!%p2315_p6)
}
  0xe3   :  { %s2319_s11 = scalar_lea.vmem %s2844_s0, 1024  ;;  %p2324_p8 = scmp.lt.s32.totalorder %s2844_s0, %s2844_s0 }
  0xe4   :  { %p2320_p7 = scmp.ne.s32.totalorder %s2844_s0, %s2319_s11  ;;  %p2325_p9 = scmp.lt.s32.totalorder %s2319_s11, %s2319_s11 }
  0xe6   :  { %p2326_p10 = por %p2325_p9, %p2324_p8 }
  0xe8   :  { %p2327_p11 = pnand %p2326_p10, %p2320_p7 }
  0xea   :  { %2330 = shalt.err (!%p2327_p11)
}
  0xeb   :  { %92 = dma.hbm_to_vmem [thread:$0]  %s3110_s4, 1024, %s2844_s0, [#allocation9], %s2533_s30, %s2533_s30, %s2534_s2  }
  0xec   :  { %s2545_s28 = smov [#allocation13]   ;;  %s2546_s24 = smov [#allocation16]  }
  0xed   :  { %s111_s15 = sshll.u32 %s2545_s28, 4  ;;  %s133_s20 = sshll.u32 %s2546_s24, 4  ;;  %s112_s15 = int_to_ptr.vmem [resolvable:$true] %s111_s15  ;;  %s134_s20 = int_to_ptr.vmem [resolvable:$true] %s133_s20 }
  0xee   :  { %s2331_s1 = scalar_lea.hbm %s3112_s6, 16 }
  0xef   :  { %p2332_p12 = scmp.ne.s32.totalorder %s3112_s6, %s2331_s1  ;;  %p2335_p13 = scmp.lt.u32.totalorder %s2331_s1, %s3112_s6 }
  0xf1   :  { %p2337_p0 = pnand %p2335_p13, %p2332_p12 }
  0xf3   :  { %2340 = shalt.err (!%p2337_p0)
}
  0xf4   :  { %s2341_s4 = scalar_lea.vmem %s112_s15, 16  ;;  %s2345_s30 = scalar_lea.vmem %s112_s15, 32 }
  0xf5   :  { %p2342_p1 = scmp.ne.s32.totalorder %s112_s15, %s2341_s4  ;;  %p2346_p2 = scmp.lt.s32.totalorder %s112_s15, %s112_s15 }
  0xf6   :  { %p2347_p3 = scmp.lt.s32.totalorder %s2345_s30, %s2341_s4 }
  0xf8   :  { %p2348_p4 = por %p2347_p3, %p2346_p2 }
  0xfa   :  { %p2349_p5 = pnand %p2348_p4, %p2342_p1 }
  0xfc   :  { %2352 = shalt.err (!%p2349_p5)
}
  0xfd   :  { %114 = dma.hbm_to_vmem [thread:$0]  %s3112_s6, 16, %s112_s15, [#allocation12]  }
  0xfe   :  { %s2353_s3 = scalar_lea.hbm %s3114_s8, 16 }
  0xff   :  { %p2354_p6 = scmp.ne.s32.totalorder %s3114_s8, %s2353_s3  ;;  %p2357_p7 = scmp.lt.u32.totalorder %s2353_s3, %s3114_s8 }
 0x101   :  { %p2359_p8 = pnand %p2357_p7, %p2354_p6 }
 0x103   :  { %2362 = shalt.err (!%p2359_p8)
}
 0x104   :  { %s2363_s11 = scalar_lea.vmem %s134_s20, 16  ;;  %s2367_s23 = scalar_lea.vmem %s134_s20, 32 }
 0x105   :  { %p2364_p9 = scmp.ne.s32.totalorder %s134_s20, %s2363_s11  ;;  %p2368_p10 = scmp.lt.s32.totalorder %s134_s20, %s134_s20 }
 0x106   :  { %p2369_p11 = scmp.lt.s32.totalorder %s2367_s23, %s2363_s11 }
 0x108   :  { %p2370_p12 = por %p2369_p11, %p2368_p10 }
 0x10a   :  { %p2371_p13 = pnand %p2370_p12, %p2364_p9 }
 0x10c   :  { %2374 = shalt.err (!%p2371_p13)
}
 0x10d   :  { %136 = dma.hbm_to_vmem [thread:$0]  %s3114_s8, 16, %s134_s20, [#allocation15]  }
 0x10e   :  { %s2547_s28 = smov [#allocation19]   ;;  %s2548_s24 = smov [#allocation22]  }
 0x10f   :  { %s155_s15 = sshll.u32 %s2547_s28, 4  ;;  %s177_s9 = sshll.u32 %s2548_s24, 4  ;;  %s156_s15 = int_to_ptr.vmem [resolvable:$true] %s155_s15  ;;  %s178_s9 = int_to_ptr.vmem [resolvable:$true] %s177_s9 }
 0x110   :  { %s2375_s7 = scalar_lea.hbm %s3116_s10, 16 }
 0x111   :  { %p2376_p0 = scmp.ne.s32.totalorder %s3116_s10, %s2375_s7  ;;  %p2379_p1 = scmp.lt.u32.totalorder %s2375_s7, %s3116_s10 }
 0x113   :  { %p2381_p2 = pnand %p2379_p1, %p2376_p0 }
 0x115   :  { %2384 = shalt.err (!%p2381_p2)
}
 0x116   :  { %s2385_s8 = scalar_lea.vmem %s156_s15, 16  ;;  %s2389_s20 = scalar_lea.vmem %s156_s15, 32 }
 0x117   :  { %p2386_p3 = scmp.ne.s32.totalorder %s156_s15, %s2385_s8  ;;  %p2390_p4 = scmp.lt.s32.totalorder %s156_s15, %s156_s15 }
 0x118   :  { %p2391_p5 = scmp.lt.s32.totalorder %s2389_s20, %s2385_s8 }
 0x11a   :  { %p2392_p6 = por %p2391_p5, %p2390_p4 }
 0x11c   :  { %p2393_p7 = pnand %p2392_p6, %p2386_p3 }
 0x11e   :  { %2396 = shalt.err (!%p2393_p7)
}
 0x11f   :  { %158 = dma.hbm_to_vmem [thread:$0]  %s3116_s10, 16, %s156_s15, [#allocation18]  }
 0x120   :  { %s2397_s25 = scalar_lea.hbm %s3118_s12, 16 }
 0x121   :  { %p2398_p8 = scmp.ne.s32.totalorder %s3118_s12, %s2397_s25  ;;  %p2401_p9 = scmp.lt.u32.totalorder %s2397_s25, %s3118_s12 }
 0x123   :  { %p2403_p10 = pnand %p2401_p9, %p2398_p8 }
 0x125   :  { %2406 = shalt.err (!%p2403_p10)
}
 0x126   :  { %s2407_s26 = scalar_lea.vmem %s178_s9, 16  ;;  %s2411_s11 = scalar_lea.vmem %s178_s9, 32 }
 0x127   :  { %p2408_p11 = scmp.ne.s32.totalorder %s178_s9, %s2407_s26  ;;  %p2412_p12 = scmp.lt.s32.totalorder %s178_s9, %s178_s9 }
 0x128   :  { %p2413_p13 = scmp.lt.s32.totalorder %s2411_s11, %s2407_s26 }
 0x12a   :  { %p2414_p0 = por %p2413_p13, %p2412_p12 }
 0x12c   :  { %p2415_p1 = pnand %p2414_p0, %p2408_p11 }
 0x12e   :  { %2418 = shalt.err (!%p2415_p1)
}
 0x12f   :  { %180 = dma.hbm_to_vmem [thread:$0]  %s3118_s12, 16, %s178_s9, [#allocation21]  }
 0x130   :  { %s2549_s6 = smov [#allocation25]   ;;  %s2550_s28 = smov [#allocation28]  }
 0x131   :  { %s199_s21 = sshll.u32 %s2549_s6, 4  ;;  %s221_s15 = sshll.u32 %s2550_s28, 4  ;;  %s200_s21 = int_to_ptr.vmem [resolvable:$true] %s199_s21  ;;  %s222_s15 = int_to_ptr.vmem [resolvable:$true] %s221_s15 }
 0x132   :  { %s2419_s1 = scalar_lea.hbm %s3120_s14, 16 }
 0x133   :  { %p2420_p2 = scmp.ne.s32.totalorder %s3120_s14, %s2419_s1  ;;  %p2423_p3 = scmp.lt.u32.totalorder %s2419_s1, %s3120_s14 }
 0x135   :  { %p2425_p4 = pnand %p2423_p3, %p2420_p2 }
 0x137   :  { %2428 = shalt.err (!%p2425_p4)
}
 0x138   :  { %s2429_s12 = scalar_lea.vmem %s200_s21, 16  ;;  %s2433_s9 = scalar_lea.vmem %s200_s21, 32 }
 0x139   :  { %p2430_p5 = scmp.ne.s32.totalorder %s200_s21, %s2429_s12  ;;  %p2434_p6 = scmp.lt.s32.totalorder %s200_s21, %s200_s21 }
 0x13a   :  { %p2435_p7 = scmp.lt.s32.totalorder %s2433_s9, %s2429_s12 }
 0x13c   :  { %p2436_p8 = por %p2435_p7, %p2434_p6 }
 0x13e   :  { %p2437_p9 = pnand %p2436_p8, %p2430_p5 }
 0x140   :  { %2440 = shalt.err (!%p2437_p9)
}
 0x141   :  { %202 = dma.hbm_to_vmem [thread:$0]  %s3120_s14, 16, %s200_s21, [#allocation24]  }
 0x142   :  { %s2441_s2 = scalar_lea.hbm %s3122_s16, 16 }
 0x143   :  { %p2442_p10 = scmp.ne.s32.totalorder %s3122_s16, %s2441_s2  ;;  %p2445_p11 = scmp.lt.u32.totalorder %s2441_s2, %s3122_s16 }
 0x145   :  { %p2447_p12 = pnand %p2445_p11, %p2442_p10 }
 0x147   :  { %2450 = shalt.err (!%p2447_p12)
}
 0x148   :  { %s2451_s17 = scalar_lea.vmem %s222_s15, 16  ;;  %s2455_s19 = scalar_lea.vmem %s222_s15, 32 }
 0x149   :  { %p2452_p13 = scmp.ne.s32.totalorder %s222_s15, %s2451_s17  ;;  %p2456_p0 = scmp.lt.s32.totalorder %s222_s15, %s222_s15 }
 0x14a   :  { %p2457_p1 = scmp.lt.s32.totalorder %s2455_s19, %s2451_s17 }
 0x14c   :  { %p2458_p2 = por %p2457_p1, %p2456_p0 }
 0x14e   :  { %p2459_p3 = pnand %p2458_p2, %p2452_p13 }
 0x150   :  { %2462 = shalt.err (!%p2459_p3)
}
 0x151   :  { %224 = dma.hbm_to_vmem [thread:$0]  %s3122_s16, 16, %s222_s15, [#allocation27]  }
 0x152   :  { %s2551_s26 = smov [#allocation31]   ;;  %s3146_s6 = sld [smem:[#allocation48_spill]] }
 0x153   :  { %s243_s11 = sshll.u32 %s2551_s26, 4  ;;  %s244_s11 = int_to_ptr.vmem [resolvable:$true] %s243_s11 }
 0x158   :  { %s2463_s21 = scalar_lea.hbm %s3146_s6, 16 }
 0x159   :  { %p2464_p4 = scmp.ne.s32.totalorder %s3146_s6, %s2463_s21  ;;  %p2467_p5 = scmp.lt.u32.totalorder %s2463_s21, %s3146_s6 }
 0x15b   :  { %p2469_p6 = pnand %p2467_p5, %p2464_p4 }
 0x15d   :  { %2472 = shalt.err (!%p2469_p6)
}
 0x15e   :  { %s2473_s7 = scalar_lea.vmem %s244_s11, 16  ;;  %s2477_s16 = scalar_lea.vmem %s244_s11, 32 }
 0x15f   :  { %p2474_p7 = scmp.ne.s32.totalorder %s244_s11, %s2473_s7  ;;  %p2478_p8 = scmp.lt.s32.totalorder %s244_s11, %s244_s11 }
 0x160   :  { %p2479_p9 = scmp.lt.s32.totalorder %s2477_s16, %s2473_s7 }
 0x162   :  { %p2480_p10 = por %p2479_p9, %p2478_p8 }
 0x164   :  { %p2481_p11 = pnand %p2480_p10, %p2474_p7 }
 0x166   :  { %2484 = shalt.err (!%p2481_p11)
}
 0x167   :  { %246 = dma.hbm_to_vmem [thread:$0]  %s3146_s6, 16, %s244_s11, [#allocation30]  }
 0x168   :  { %2507 = dma.done.wait [#allocation3], 256  }
 0x169   :  { %2508 = vsyncadd [#allocation3], 4294967040 }
 0x16a   :  { %2509 = dma.done.wait [#allocation6], 384  }
 0x16b   :  { %2510 = vsyncadd [#allocation6], 4294966912 }
 0x16c   :  { %2511 = dma.done.wait [#allocation9], 1536  }
 0x16d   :  { %2512 = vsyncadd [#allocation9], 4294965760 }
 0x16e   :  { %2513 = dma.done.wait [#allocation12], 144  }
 0x16f   :  { %2514 = vsyncadd [#allocation12], 4294967152 }
 0x170   :  { %2515 = dma.done.wait [#allocation15], 1040  }
 0x171   :  { %2516 = vsyncadd [#allocation15], 4294966256 }
 0x172   :  { %2517 = dma.done.wait [#allocation18], 656  }
 0x173   :  { %2518 = vsyncadd [#allocation18], 4294966640 }
 0x174   :  { %2519 = dma.done.wait [#allocation21], 1040  }
 0x175   :  { %2520 = vsyncadd [#allocation21], 4294966256 }
 0x176   :  { %2521 = dma.done.wait [#allocation24], 1040  }
 0x177   :  { %2522 = vsyncadd [#allocation24], 4294966256 }
 0x178   :  { %2523 = dma.done.wait [#allocation27], 1040  }
 0x179   :  { %2524 = vsyncadd [#allocation27], 4294966256 }
 0x17a   :  { %2525 = dma.done.wait [#allocation30], 1040  }
 0x17b   :  { %2526 = vsyncadd [#allocation30], 4294966256  ;;  %v2552_v0 = vmov 2   ;;  %v2553_v1 = vmov 0   ;;  %v2554_v2 = vmov 0.0   ;;  %v307_v3 = vld [vmem:[#allocation2] sm:$0xff]  ;;  %v305_v13 = vlaneseq }
 0x17c   :  { %1995 = vset.pattern.permute.xlu1 %v2552_v0  ;;  %1993 = vset.pattern.permute.xlu0 %v2553_v1  ;;  %v2555_v4 = vmov 3   ;;  %v2556_v5 = vmov 1   ;;  %v488_v6 = vld [vmem:[#allocation5] sm:$0xff]  ;;  %v2009_v7 = vld [vmem:[#allocation8] sm:$0xff]   ;;  %vm2557_vm0 = vmmov 0   ;;  %v595_v10 = vld [vmem:[#allocation5 + $0x8] sm:$0xff] }
 0x17d   :  { %1787 = vmatprep.subr.bf16.mxu0 %v2554_v2  ;;  %1795 = vmatprep.subr.bf16.mxu1 %v2554_v2  ;;  %v2010_v8 = vld [vmem:[#allocation8 + $0x8] sm:$0xff]   ;;  %v398_v9 = vld [vmem:[#allocation2 + $0x8] sm:$0xff]  ;;  %v2015_v11 = vld [vmem:[#allocation8 + $0x10] sm:$0xff]   ;;  %v2972_v14 = vand.u32 127, %v305_v13  ;;  %vm353_vm5 = vcmask 261120   ;;  %vm550_vm13 = vcmask 523264  }
 0x17e   :  { %323 = vperm.xlu1 %1995, %v307_v3   ;;  %309 = vperm.xlu0 %1993, %v307_v3   ;;  %v2017_v12 = vld [vmem:[#allocation8 + $0x18] sm:$0xff]   ;;  %v2011_v28 = vld [vmem:[#allocation10] sm:$0xff]   ;;  %v2012_v34 = vld [vmem:[#allocation10 + $0x8] sm:$0xff]   ;;  %s2558_s18 = smov [#allocation32]  }
 0x17f   :  { %1788 = vmatpush3.bf16.msra.mxu0 %v2009_v7  ;;  %1791 = vmatprep.mubr.msk.bf16.mxu0 %vm2557_vm0, %v2554_v2  ;;  %v2013_v38 = vld [vmem:[#allocation10 + $0x10] sm:$0xff]   ;;  %v2014_v44 = vld [vmem:[#allocation10 + $0x18] sm:$0xff]   ;;  %v2016_v49 = vld [vmem:[#allocation11] sm:$0xff]   ;;  %s1605_s13 = sshll.u32 %s2558_s18, 4  ;;  %s1606_s13 = int_to_ptr.vmem [resolvable:$true] %s1605_s13 }
 0x180   :  { %1789 = vmatprep.subr.bf16.mxu0 %v2554_v2  ;;  %1799 = vmatprep.mubr.msk.bf16.mxu1 %vm2557_vm0, %v2554_v2  ;;  %v701_v56 = vld [vmem:[#allocation7] sm:$0xff]  ;;  %v2018_v57 = vld [vmem:[#allocation10 + $0x20] sm:$0xff]   ;;  %v2019_v63 = vld [vmem:[#allocation10 + $0x28] sm:$0xff]   ;;  %s2485_s12 = scalar_lea.vmem %s1606_s13, 128  ;;  %p2490_p13 = scmp.lt.s32.totalorder %s1606_s13, %s1606_s13 }
 0x181   :  { %1796 = vmatpush3.bf16.msra.mxu1 %v2015_v11  ;;  %v702_v60 = vpack.c.bf16 %v701_v56, %v701_v56  ;;  %v2021_v7 = vld [vmem:[#allocation10 + $0x38] sm:$0xff]   ;;  %v2022_v11 = vld [vmem:[#allocation14] sm:$0xff]   ;;  %p2486_p12 = scmp.ne.s32.totalorder %s1606_s13, %s2485_s12  ;;  %p2491_p0 = scmp.lt.s32.totalorder %s2485_s12, %s2485_s12 }
 0x182   :  { %1996 = vset.pattern.permute.xlu1 %v2555_v4  ;;  %1994 = vset.pattern.permute.xlu0 %v2556_v5  ;;  %v2024_v13 = vld [vmem:[#allocation14 + $0x10] sm:$0xff]  }
 0x183   :  { %330 = vperm.xlu1 %1996, %v307_v3   ;;  %316 = vperm.xlu0 %1994, %v307_v3   ;;  %v2039_v56 = vld [vmem:[#allocation20 + $0x20] sm:$0xff]   ;;  %p2492_p1 = por %p2491_p0, %p2490_p13 }
 0x184   :  { %1790 = vmatpush3.bf16.msra.mxu0 %v2010_v8  ;;  %1797 = vmatprep.subr.bf16.mxu1 %v2554_v2 }
 0x185   :  { %1803 = vmatprep.subr.bf16.mxu0 %v2554_v2  ;;  %1798 = vmatpush3.bf16.msra.mxu1 %v2017_v12  ;;  %v2023_v12 = vld [vmem:[#allocation14 + $0x8] sm:$0xff]   ;;  %p2493_p2 = pnand %p2492_p1, %p2486_p12 }
 0x186   :  { %1815 = vmatprep.subr.bf16.mxu1 %v2554_v2 }
 0x187   :  { %1997 = vset.pattern.permute.xlu1 %v2553_v1  ;;  %497 = vperm.xlu0 %1994, %v488_v6  }
 0x188   :  { %490 = vperm.xlu1 %1997, %v488_v6  }
 0x18b   :  { %1999 = vset.pattern.permute.xlu0 %v2555_v4 }
 0x18c   :  { %1998 = vset.pattern.permute.xlu1 %v2552_v0  ;;  %511 = vperm.xlu0 %1999, %v488_v6  }
 0x18d   :  { %504 = vperm.xlu1 %1998, %v488_v6  }
 0x190   :  { %2002 = vset.pattern.permute.xlu0 %v2552_v0 }
 0x191   :  { %2000 = vset.pattern.permute.xlu1 %v2553_v1  ;;  %414 = vperm.xlu0 %2002, %v398_v9  }
 0x192   :  { %400 = vperm.xlu1 %2000, %v398_v9  }
 0x195   :  { %2005 = vset.pattern.permute.xlu0 %v2556_v5 }
 0x196   :  { %2001 = vset.pattern.permute.xlu1 %v2556_v5  ;;  %604 = vperm.xlu0 %2005, %v595_v10  }
 0x197   :  { %407 = vperm.xlu1 %2001, %v398_v9  }
 0x19a   :  { %2008 = vset.pattern.permute.xlu0 %v2555_v4 }
 0x19b   :  { %2003 = vset.pattern.permute.xlu1 %v2555_v4 }
 0x19c   :  { %421 = vperm.xlu1 %2003, %v398_v9  }
 0x1a0   :  { %2004 = vset.pattern.permute.xlu1 %v2553_v1 }
 0x1a1   :  { %597 = vperm.xlu1 %2004, %v595_v10  }
 0x1a5   :  { %2006 = vset.pattern.permute.xlu1 %v2552_v0 }
 0x1a6   :  { %611 = vperm.xlu1 %2006, %v595_v10  }
 0x1aa   :  { %2007 = vset.pattern.permute.xlu1 %v2555_v4  ;;  %v2020_v4 = vld [vmem:[#allocation10 + $0x30] sm:$0xff]  }
 0x1ab   :  { %618 = vperm.xlu1 %2007, %v595_v10  }
 0x1fd   :  { %v310_v15 = vpop.permute.xlu0 %309  ;;  %v324_v16 = vpop.permute.xlu1 %323 }
 0x1fe   :  { %vm311_vm1 = vcmp.eq.s32.totalorder %v310_v15, %v2972_v14  ;;  %vm325_vm2 = vcmp.eq.s32.totalorder %v324_v16, %v2972_v14  ;;  %v2026_v15 = vld [vmem:[#allocation14 + $0x20] sm:$0xff]   ;;  %v2027_v16 = vld [vmem:[#allocation14 + $0x28] sm:$0xff]  }
 0x1ff   :  { %v1623_v19 = vsel %vm311_vm1, 1.0, %v2554_v2  ;;  %v1625_v22 = vsel %vm325_vm2, 1.0, %v2554_v2  ;;  %vm718_vm2 = vcmask 130048  }
 0x202   :  { %v317_v17 = vpop.permute.xlu0 %316  ;;  %v331_v18 = vpop.permute.xlu1 %330 }
 0x203   :  { %vm318_vm3 = vcmp.eq.s32.totalorder %v317_v17, %v2972_v14  ;;  %vm332_vm4 = vcmp.eq.s32.totalorder %v331_v18, %v2972_v14  ;;  %v2028_v17 = vld [vmem:[#allocation17 + $0x8] sm:$0xff]  }
 0x204   :  { %v1624_v20 = vsel %vm318_vm3, 1.0, %v2554_v2  ;;  %v1626_v23 = vsel %vm332_vm4, 1.0, %v2554_v2  ;;  %v2029_v18 = vld [vmem:[#allocation14 + $0x30] sm:$0xff]  }
 0x205   :  { %v321_v21 = vadd.f32 %v1624_v20, %v1623_v19  ;;  %v2030_v19 = vld [vmem:[#allocation14 + $0x38] sm:$0xff]  }
 0x206   :  { %v498_v26 = vpop.permute.xlu0 %497 }
 0x207   :  { %v328_v24 = vadd.f32 %v1625_v22, %v321_v21  ;;  %v491_v25 = vpop.permute.xlu1 %490  ;;  %vm499_vm6 = vcmp.eq.s32.totalorder %v498_v26, %v2972_v14 }
 0x208   :  { %vm492_vm7 = vcmp.eq.s32.totalorder %v491_v25, %v2972_v14  ;;  %v1638_v31 = vsel %vm499_vm6, 1.0, %v2554_v2 }
 0x209   :  { %v335_v27 = vadd.f32 %v1626_v23, %v328_v24  ;;  %v1637_v32 = vsel %vm492_vm7, 1.0, %v2554_v2 }
 0x20a   :  { %v502_v36 = vadd.f32 %v1638_v31, %v1637_v32  ;;  %v1655_v31 = vld [vmem:[#allocation13] ss:$0 sm:$0xff] }
 0x20b   :  { %v336_v29 = vpack.c.bf16 %v335_v27, %v335_v27  ;;  %v512_v33 = vpop.permute.xlu0 %511 }
 0x20c   :  { %v505_v30 = vpop.permute.xlu1 %504  ;;  %vm513_vm9 = vcmp.eq.s32.totalorder %v512_v33, %v2972_v14 }
 0x20d   :  { %vm506_vm8 = vcmp.eq.s32.totalorder %v505_v30, %v2972_v14  ;;  %1792 = vmatmul.mubr.msk.bf16.vlgmr.msra.gmra.mrb[0].mxu0 %vm353_vm5, %v336_v29  ;;  %v1640_v41 = vsel %vm513_vm9, 1.0, %v2554_v2  ;;  %v2031_v29 = vld [vmem:[#allocation17] sm:$0xff]  }
 0x20e   :  { %1804 = vmatpush3.bf16.msra.mxu0 %v2011_v28  ;;  %1811 = vmatprep.mubr.msk.bf16.mxu0 %vm2557_vm0, %v2554_v2  ;;  %v1639_v35 = vsel %vm506_vm8, 1.0, %v2554_v2 }
 0x20f   :  { %1805 = vmatprep.subr.bf16.mxu0 %v2554_v2  ;;  %v509_v40 = vadd.f32 %v1639_v35, %v502_v36 }
 0x210   :  { %v415_v39 = vpop.permute.xlu0 %414 }
 0x211   :  { %v401_v37 = vpop.permute.xlu1 %400  ;;  %vm416_vm11 = vcmp.eq.s32.totalorder %v415_v39, %v2972_v14  ;;  %v516_v45 = vadd.f32 %v1640_v41, %v509_v40 }
 0x212   :  { %1806 = vmatpush3.bf16.msra.mxu0 %v2012_v34  ;;  %vm402_vm10 = vcmp.eq.s32.totalorder %v401_v37, %v2972_v14  ;;  %v1632_v47 = vsel %vm416_vm11, 1.0, %v2554_v2 }
 0x213   :  { %1807 = vmatprep.subr.bf16.mxu0 %v2554_v2  ;;  %v1630_v42 = vsel %vm402_vm10, 1.0, %v2554_v2  ;;  %v517_v50 = vpack.c.bf16 %v516_v45, %v516_v45  ;;  %v2033_v45 = vld [vmem:[#allocation17 + $0x18] sm:$0xff]  }
 0x215   :  { %v605_v53 = vpop.permute.xlu0 %604 }
 0x216   :  { %1808 = vmatpush3.bf16.msra.mxu0 %v2013_v38  ;;  %v408_v43 = vpop.permute.xlu1 %407  ;;  %vm606_vm15 = vcmp.eq.s32.totalorder %v605_v53, %v2972_v14  ;;  %v2036_v53 = vld [vmem:[#allocation20 + $0x8] sm:$0xff]  }
 0x217   :  { %vm409_vm12 = vcmp.eq.s32.totalorder %v408_v43, %v2972_v14  ;;  %1809 = vmatprep.subr.bf16.mxu0 %v2554_v2  ;;  %v1647_v62 = vsel %vm606_vm15, 1.0, %v2554_v2 }
 0x218   :  { %v1631_v46 = vsel %vm409_vm12, 1.0, %v2554_v2 }
 0x219   :  { %v412_v48 = vadd.f32 %v1631_v46, %v1630_v42  ;;  %v2032_v42 = vld [vmem:[#allocation17 + $0x10] sm:$0xff]  }
 0x21a   :  { %1810 = vmatpush3.bf16.msra.mxu0 %v2014_v44 }
 0x21b   :  { %v419_v51 = vadd.f32 %v1632_v47, %v412_v48  ;;  %v422_v52 = vpop.permute.xlu1 %421  ;;  %1827 = vmatprep.subr.bf16.mxu0 %v2554_v2 }
 0x21c   :  { %vm423_vm14 = vcmp.eq.s32.totalorder %v422_v52, %v2972_v14  ;;  %v2035_v52 = vld [vmem:[#allocation20] sm:$0xff]  }
 0x21d   :  { %v1633_v54 = vsel %vm423_vm14, 1.0, %v2554_v2  ;;  %1812 = vmatmul.mubr.msk.bf16.vlgmr.msra.gmra.mrb[4].mxu0 %vm550_vm13, %v517_v50 }
 0x21e   :  { %v426_v55 = vadd.f32 %v1633_v54, %v419_v51  ;;  %1828 = vmatpush3.bf16.msra.mxu0 %v2016_v49  ;;  %1829 = vmatprep.mubr.msk.bf16.mxu0 %vm2557_vm0, %v2554_v2  ;;  %v2034_v51 = vld [vmem:[#allocation17 + $0x20] sm:$0xff]  }
 0x21f   :  { %1853 = vmatprep.subr.bf16.mxu0 %v2554_v2  ;;  %v2037_v54 = vld [vmem:[#allocation20 + $0x10] sm:$0xff]  }
 0x220   :  { %v427_v58 = vpack.c.bf16 %v426_v55, %v426_v55  ;;  %v598_v59 = vpop.permute.xlu1 %597  ;;  %v2038_v55 = vld [vmem:[#allocation20 + $0x18] sm:$0xff]  }
 0x221   :  { %vm599_vm1 = vcmp.eq.s32.totalorder %v598_v59, %v2972_v14 }
 0x222   :  { %1800 = vmatmul.mubr.msk.bf16.vlgmr.msra.gmra.mrb[0].mxu1 %vm353_vm5, %v427_v58  ;;  %v1646_v61 = vsel %vm599_vm1, 1.0, %v2554_v2 }
 0x223   :  { %1816 = vmatpush3.bf16.msra.mxu1 %v2018_v57  ;;  %1823 = vmatprep.mubr.msk.bf16.mxu1 %vm2557_vm0, %v2554_v2  ;;  %v609_v1 = vadd.f32 %v1647_v62, %v1646_v61  ;;  %v2040_v57 = vld [vmem:[#allocation20 + $0x28] sm:$0xff]   ;;  %v1658_v62 = vld [vmem:[#allocation16] ss:$0 sm:$0xff] }
 0x224   :  { %1817 = vmatprep.subr.bf16.mxu1 %v2554_v2 }
 0x225   :  { %1830 = vmatmul.mubr.msk.bf16.vlgmr.msra.gmra.mrb[8].mxu0 %vm718_vm2, %v702_v60  ;;  %v612_v0 = vpop.permute.xlu1 %611 }
 0x226   :  { %vm613_vm3 = vcmp.eq.s32.totalorder %v612_v0, %v2972_v14  ;;  %1855 = vmatprep.mubr.msk.bf16.mxu0 %vm2557_vm0, %v2554_v2  ;;  %1854 = vmatpush3.bf16.msra.mxu0 %v2028_v17 }
 0x227   :  { %v1648_v3 = vsel %vm613_vm3, 1.0, %v2554_v2  ;;  %1818 = vmatpush3.bf16.msra.mxu1 %v2019_v63  ;;  %1859 = vmatprep.subr.bf16.mxu0 %v2554_v2 }
 0x228   :  { %1819 = vmatprep.subr.bf16.mxu1 %v2554_v2  ;;  %v616_v5 = vadd.f32 %v1648_v3, %v609_v1 }
 0x22a   :  { %v619_v6 = vpop.permute.xlu1 %618 }
 0x22b   :  { %vm620_vm4 = vcmp.eq.s32.totalorder %v619_v6, %v2972_v14  ;;  %1820 = vmatpush3.bf16.msra.mxu1 %v2020_v4  ;;  %v2025_v14 = vld [vmem:[#allocation14 + $0x18] sm:$0xff]  }
 0x22c   :  { %v1649_v8 = vsel %vm620_vm4, 1.0, %v2554_v2  ;;  %1821 = vmatprep.subr.bf16.mxu1 %v2554_v2 }
 0x22d   :  { %v623_v9 = vadd.f32 %v1649_v8, %v616_v5 }
 0x22f   :  { %v624_v10 = vpack.c.bf16 %v623_v9, %v623_v9  ;;  %1822 = vmatpush3.bf16.msra.mxu1 %v2021_v7 }
 0x230   :  { %1833 = vmatprep.subr.bf16.mxu1 %v2554_v2 }
 0x232   :  { %1824 = vmatmul.mubr.msk.bf16.vlgmr.msra.gmra.mrb[4].mxu1 %vm550_vm13, %v624_v10 }
 0x233   :  { %1834 = vmatpush3.bf16.msra.mxu1 %v2022_v11  ;;  %1849 = vmatprep.mubr.msk.bf16.mxu1 %vm2557_vm0, %v2554_v2 }
 0x234   :  { %1835 = vmatprep.subr.bf16.mxu1 %v2554_v2 }
 0x237   :  { %1836 = vmatpush3.bf16.msra.mxu1 %v2023_v12 }
 0x238   :  { %1837 = vmatprep.subr.bf16.mxu1 %v2554_v2 }
 0x23b   :  { %1838 = vmatpush3.bf16.msra.mxu1 %v2024_v13 }
 0x23c   :  { %1839 = vmatprep.subr.bf16.mxu1 %v2554_v2 }
 0x23f   :  { %1840 = vmatpush3.bf16.msra.mxu1 %v2025_v14 }
 0x240   :  { %1841 = vmatprep.subr.bf16.mxu1 %v2554_v2 }
 0x243   :  { %1842 = vmatpush3.bf16.msra.mxu1 %v2026_v15 }
 0x244   :  { %1843 = vmatprep.subr.bf16.mxu1 %v2554_v2 }
 0x247   :  { %1844 = vmatpush3.bf16.msra.mxu1 %v2027_v16 }
 0x248   :  { %1845 = vmatprep.subr.bf16.mxu1 %v2554_v2 }
 0x24b   :  { %1846 = vmatpush3.bf16.msra.mxu1 %v2029_v18 }
 0x24c   :  { %1847 = vmatprep.subr.bf16.mxu1 %v2554_v2 }
 0x24f   :  { %1848 = vmatpush3.bf16.msra.mxu1 %v2030_v19 }
 0x250   :  { %1877 = vmatprep.subr.bf16.mxu1 %v2554_v2 }
 0x2e0   :  { %v391_v20 = vpop.f32.mrb[0].mxu0 }
 0x2e1   :  { %v1793_v21 = vpop.f32.mrb[1].mxu0  ;;  %v875_v43 = vpack.c.bf16 %v391_v20, %v391_v20 }
 0x2e2   :  { %v394_v22 = vpop.f32.mrb[2].mxu0  ;;  %v2041_v21 = vld [vmem:[#allocation20 + $0x30] sm:$0xff]  }
 0x2e3   :  { %v1794_v23 = vpop.f32.mrb[3].mxu0  ;;  %v2042_v22 = vld [vmem:[#allocation20 + $0x38] sm:$0xff]  }
 0x2e4   :  { %v2043_v23 = vld [vmem:[#allocation23] sm:$0xff]  }
 0x2f0   :  { %v588_v24 = vpop.f32.mrb[4].mxu0 }
 0x2f1   :  { %v1813_v25 = vpop.f32.mrb[5].mxu0  ;;  %v979_v46 = vpack.c.bf16 %v588_v24, %v588_v24  ;;  %v2044_v24 = vld [vmem:[#allocation23 + $0x8] sm:$0xff]  }
 0x2f2   :  { %v591_v26 = vpop.f32.mrb[6].mxu0  ;;  %v2045_v25 = vld [vmem:[#allocation23 + $0x10] sm:$0xff]  }
 0x2f3   :  { %v1814_v27 = vpop.f32.mrb[7].mxu0  ;;  %v2046_v26 = vld [vmem:[#allocation23 + $0x18] sm:$0xff]  }
 0x2f4   :  { %v2047_v27 = vld [vmem:[#allocation23 + $0x20] sm:$0xff]  }
 0x2f5   :  { %v482_v28 = vpop.f32.mrb[0].mxu1 }
 0x2f6   :  { %v878_v30 = vpack.c.bf16 %v482_v28, %v482_v28  ;;  %v1801_v32 = vpop.f32.mrb[1].mxu1  ;;  %v2048_v28 = vld [vmem:[#allocation23 + $0x28] sm:$0xff]  }
 0x2f7   :  { %v485_v33 = vpop.f32.mrb[2].mxu1 }
 0x2f8   :  { %v756_v34 = vpop.f32.mrb[8].mxu0  ;;  %1856 = vmatmul.mubr.msk.bf16.vlgmr.msra.gmra.mrb[12].mxu0 %vm718_vm2, %v878_v30  ;;  %v1802_v35 = vpop.f32.mrb[3].mxu1  ;;  %v1677_v30 = vld [vmem:[#allocation19] ss:$0 sm:$0xff] }
 0x2f9   :  { %v757_v36 = vadd.f32 %v1655_v31, %v756_v34  ;;  %v1831_v37 = vpop.f32.mrb[9].mxu0  ;;  %1860 = vmatpush3.bf16.msra.mxu0 %v2031_v29  ;;  %1861 = vmatprep.mubr.msk.bf16.mxu0 %vm2557_vm0, %v2554_v2 }
 0x2fa   :  { %v759_v38 = vpop.f32.mrb[10].mxu0  ;;  %1865 = vmatprep.subr.bf16.mxu0 %v2554_v2 }
 0x2fb   :  { %v762_v39 = vmax.f32 %v757_v36, 0.0  ;;  %v1832_v40 = vpop.f32.mrb[11].mxu0  ;;  %v2049_v38 = vld [vmem:[#allocation23 + $0x30] sm:$0xff]  }
 0x2fc   :  { %v2051_v40 = vld [vmem:[#allocation26] sm:$0xff]  }
 0x2fd   :  { %v763_v41 = vpack.c.bf16 %v762_v39, %v762_v39  ;;  %v2050_v39 = vld [vmem:[#allocation23 + $0x38] sm:$0xff]  }
 0x2ff   :  { %1850 = vmatmul.mubr.bf16.vlgmr.msra.gmra.mrb[8].mxu1 %v763_v41  ;;  %v2052_v41 = vld [vmem:[#allocation26 + $0x8] sm:$0xff]  }
 0x300   :  { %1862 = vmatmul.mubr.msk.bf16.vlgmr.msra.gmra.mrb[16].mxu0 %vm718_vm2, %v875_v43  ;;  %1879 = vmatprep.mubr.msk.bf16.mxu1 %vm2557_vm0, %v2554_v2  ;;  %v2054_v43 = vld [vmem:[#allocation26 + $0x18] sm:$0xff]  }
 0x301   :  { %1866 = vmatpush3.bf16.msra.mxu0 %v2032_v42  ;;  %1867 = vmatprep.mubr.msk.bf16.mxu0 %vm2557_vm0, %v2554_v2  ;;  %v2053_v42 = vld [vmem:[#allocation26 + $0x10] sm:$0xff]  }
 0x302   :  { %1871 = vmatprep.subr.bf16.mxu0 %v2554_v2  ;;  %1878 = vmatpush3.bf16.msra.mxu1 %v2034_v51 }
 0x303   :  { %1903 = vmatprep.subr.bf16.mxu1 %v2554_v2 }
 0x305   :  { %v695_v44 = vpop.f32.mrb[4].mxu1 }
 0x306   :  { %v1825_v47 = vpop.f32.mrb[5].mxu1  ;;  %v1032_v50 = vpack.c.bf16 %v695_v44, %v695_v44  ;;  %v2055_v44 = vld [vmem:[#allocation26 + $0x20] sm:$0xff]  }
 0x307   :  { %v698_v48 = vpop.f32.mrb[6].mxu1 }
 0x308   :  { %1868 = vmatmul.mubr.msk.bf16.vlgmr.msra.gmra.mrb[20].mxu0 %vm718_vm2, %v979_v46  ;;  %v1826_v49 = vpop.f32.mrb[7].mxu1  ;;  %v1678_v46 = vld [vmem:[#allocation22] ss:$0 sm:$0xff] }
 0x309   :  { %1872 = vmatpush3.bf16.msra.mxu0 %v2033_v45  ;;  %1873 = vmatprep.mubr.msk.bf16.mxu0 %vm2557_vm0, %v2554_v2  ;;  %v2056_v45 = vld [vmem:[#allocation26 + $0x28] sm:$0xff]  }
 0x30a   :  { %1883 = vmatprep.subr.bf16.mxu0 %v2554_v2 }
 0x310   :  { %1874 = vmatmul.mubr.msk.bf16.vlgmr.msra.gmra.mrb[24].mxu0 %vm718_vm2, %v1032_v50 }
 0x311   :  { %1899 = vmatprep.mubr.msk.bf16.mxu0 %vm2557_vm0, %v2554_v2  ;;  %1884 = vmatpush3.bf16.msra.mxu0 %v2035_v52 }
 0x312   :  { %1885 = vmatprep.subr.bf16.mxu0 %v2554_v2 }
 0x315   :  { %1886 = vmatpush3.bf16.msra.mxu0 %v2036_v53 }
 0x316   :  { %1887 = vmatprep.subr.bf16.mxu0 %v2554_v2 }
 0x319   :  { %1888 = vmatpush3.bf16.msra.mxu0 %v2037_v54  ;;  %v2057_v54 = vld [vmem:[#allocation26 + $0x30] sm:$0xff]  }
 0x31a   :  { %1889 = vmatprep.subr.bf16.mxu0 %v2554_v2 }
 0x31d   :  { %1890 = vmatpush3.bf16.msra.mxu0 %v2038_v55  ;;  %v2058_v55 = vld [vmem:[#allocation26 + $0x38] sm:$0xff]  }
 0x31e   :  { %1891 = vmatprep.subr.bf16.mxu0 %v2554_v2 }
 0x321   :  { %1892 = vmatpush3.bf16.msra.mxu0 %v2039_v56  ;;  %v2059_v56 = vld [vmem:[#allocation29] sm:$0xff]  }
 0x322   :  { %1893 = vmatprep.subr.bf16.mxu0 %v2554_v2 }
 0x325   :  { %1894 = vmatpush3.bf16.msra.mxu0 %v2040_v57  ;;  %v2060_v57 = vld [vmem:[#allocation29 + $0x8] sm:$0xff]  }
 0x326   :  { %1895 = vmatprep.subr.bf16.mxu0 %v2554_v2 }
 0x329   :  { %1896 = vmatpush3.bf16.msra.mxu0 %v2041_v21 }
 0x32a   :  { %1897 = vmatprep.subr.bf16.mxu0 %v2554_v2 }
 0x32d   :  { %1898 = vmatpush3.bf16.msra.mxu0 %v2042_v22 }
 0x32e   :  { %1923 = vmatprep.subr.bf16.mxu0 %v2554_v2 }
 0x3cb   :  { %v924_v58 = vpop.f32.mrb[12].mxu0 }
 0x3cc   :  { %v1857_v59 = vpop.f32.mrb[13].mxu0 }
 0x3cd   :  { %v927_v60 = vpop.f32.mrb[14].mxu0  ;;  %v2062_v59 = vld [vmem:[#allocation29 + $0x18] sm:$0xff]  }
 0x3ce   :  { %v1858_v61 = vpop.f32.mrb[15].mxu0  ;;  %v2063_v60 = vld [vmem:[#allocation29 + $0x20] sm:$0xff]  }
 0x3cf   :  { %v2064_v61 = vld [vmem:[#allocation29 + $0x28] sm:$0xff]  }
 0x3d2   :  { %v869_v63 = vpop.f32.mrb[8].mxu1 }
 0x3d3   :  { %v870_v0 = vadd.f32 %v1658_v62, %v869_v63  ;;  %v1851_v1 = vpop.f32.mrb[9].mxu1  ;;  %v973_v3 = vpop.f32.mrb[16].mxu0  ;;  %v1687_v62 = vld [vmem:[#allocation25] ss:$0 sm:$0xff] }
 0x3d4   :  { %v872_v4 = vpop.f32.mrb[10].mxu1  ;;  %v974_v5 = vadd.f32 %v973_v3, %v924_v58  ;;  %v1863_v6 = vpop.f32.mrb[17].mxu0  ;;  %v2061_v58 = vld [vmem:[#allocation29 + $0x10] sm:$0xff]  }
 0x3d5   :  { %v1085_v7 = vpack.c.bf16 %v870_v0, %v870_v0  ;;  %v1852_v8 = vpop.f32.mrb[11].mxu1  ;;  %v976_v9 = vpop.f32.mrb[18].mxu0 }
 0x3d6   :  { %v1864_v10 = vpop.f32.mrb[19].mxu0  ;;  %v2066_v8 = vld [vmem:[#allocation29 + $0x38] sm:$0xff]  }
 0x3d7   :  { %1880 = vmatmul.mubr.msk.bf16.vlgmr.msra.gmra.mrb[12].mxu1 %vm718_vm2, %v1085_v7  ;;  %v2065_v7 = vld [vmem:[#allocation29 + $0x30] sm:$0xff]   ;;  %v1696_v9 = vld [vmem:[#allocation28] ss:$0 sm:$0xff] }
 0x3d8   :  { %1919 = vmatprep.mubr.msk.bf16.mxu1 %vm2557_vm0, %v2554_v2  ;;  %1904 = vmatpush3.bf16.msra.mxu1 %v2043_v23 }
 0x3d9   :  { %1905 = vmatprep.subr.bf16.mxu1 %v2554_v2 }
 0x3db   :  { %v1025_v11 = vpop.f32.mrb[20].mxu0 }
 0x3dc   :  { %v1031_v12 = vadd.f32 %v1025_v11, %v974_v5  ;;  %v1869_v13 = vpop.f32.mrb[21].mxu0  ;;  %1906 = vmatpush3.bf16.msra.mxu1 %v2044_v24 }
 0x3dd   :  { %v1028_v14 = vpop.f32.mrb[22].mxu0  ;;  %1907 = vmatprep.subr.bf16.mxu1 %v2554_v2 }
 0x3de   :  { %v1870_v15 = vpop.f32.mrb[23].mxu0 }
 0x3e0   :  { %1908 = vmatpush3.bf16.msra.mxu1 %v2045_v25 }
 0x3e1   :  { %1909 = vmatprep.subr.bf16.mxu1 %v2554_v2 }
 0x3e3   :  { %v1078_v16 = vpop.f32.mrb[24].mxu0 }
 0x3e4   :  { %v1084_v17 = vadd.f32 %v1078_v16, %v1031_v12  ;;  %v1875_v18 = vpop.f32.mrb[25].mxu0  ;;  %1910 = vmatpush3.bf16.msra.mxu1 %v2046_v26 }
 0x3e5   :  { %v1081_v19 = vpop.f32.mrb[26].mxu0  ;;  %1911 = vmatprep.subr.bf16.mxu1 %v2554_v2 }
 0x3e6   :  { %v1876_v20 = vpop.f32.mrb[27].mxu0 }
 0x3e8   :  { %1912 = vmatpush3.bf16.msra.mxu1 %v2047_v27 }
 0x3e9   :  { %1913 = vmatprep.subr.bf16.mxu1 %v2554_v2 }
 0x3ec   :  { %1914 = vmatpush3.bf16.msra.mxu1 %v2048_v28 }
 0x3ed   :  { %1915 = vmatprep.subr.bf16.mxu1 %v2554_v2 }
 0x3f0   :  { %1916 = vmatpush3.bf16.msra.mxu1 %v2049_v38 }
 0x3f1   :  { %1917 = vmatprep.subr.bf16.mxu1 %v2554_v2 }
 0x3f4   :  { %1918 = vmatpush3.bf16.msra.mxu1 %v2050_v39 }
 0x3f5   :  { %1943 = vmatprep.subr.bf16.mxu1 %v2554_v2 }
 0x4aa   :  { %v1131_v29 = vpop.f32.mrb[12].mxu1 }
 0x4ab   :  { %v1137_v31 = vadd.f32 %v1131_v29, %v1084_v17  ;;  %v1881_v32 = vpop.f32.mrb[13].mxu1  ;;  %v1705_v17 = vld [vmem:[#allocation31] ss:$0 sm:$0xff] }
 0x4ac   :  { %v1134_v33 = vpop.f32.mrb[14].mxu1 }
 0x4ad   :  { %v1145_v34 = vadd.f32 %v1677_v30, %v1137_v31  ;;  %v1882_v35 = vpop.f32.mrb[15].mxu1 }
 0x4af   :  { %v1146_v36 = vmax.f32 %v1145_v34, 0.0 }
 0x4b1   :  { %v1147_v37 = vpack.c.bf16 %v1146_v36, %v1146_v36 }
 0x4b3   :  { %1900 = vmatmul.mubr.bf16.vlgmr.msra.gmra.mrb[28].mxu0 %v1147_v37 }
 0x4b4   :  { %1939 = vmatprep.mubr.msk.bf16.mxu0 %vm2557_vm0, %v2554_v2  ;;  %1924 = vmatpush3.bf16.msra.mxu0 %v2051_v40 }
 0x4b5   :  { %1925 = vmatprep.subr.bf16.mxu0 %v2554_v2 }
 0x4b8   :  { %1926 = vmatpush3.bf16.msra.mxu0 %v2052_v41 }
 0x4b9   :  { %1927 = vmatprep.subr.bf16.mxu0 %v2554_v2 }
 0x4bc   :  { %1928 = vmatpush3.bf16.msra.mxu0 %v2053_v42 }
 0x4bd   :  { %1929 = vmatprep.subr.bf16.mxu0 %v2554_v2 }
 0x4c0   :  { %1930 = vmatpush3.bf16.msra.mxu0 %v2054_v43 }
 0x4c1   :  { %1931 = vmatprep.subr.bf16.mxu0 %v2554_v2 }
 0x4c4   :  { %1932 = vmatpush3.bf16.msra.mxu0 %v2055_v44 }
 0x4c5   :  { %1933 = vmatprep.subr.bf16.mxu0 %v2554_v2 }
 0x4c8   :  { %1934 = vmatpush3.bf16.msra.mxu0 %v2056_v45 }
 0x4c9   :  { %1935 = vmatprep.subr.bf16.mxu0 %v2554_v2 }
 0x4cc   :  { %1936 = vmatpush3.bf16.msra.mxu0 %v2057_v54 }
 0x4cd   :  { %1937 = vmatprep.subr.bf16.mxu0 %v2554_v2 }
 0x4d0   :  { %1938 = vmatpush3.bf16.msra.mxu0 %v2058_v55 }
 0x586   :  { %v1253_v47 = vpop.f32.mrb[28].mxu0 }
 0x587   :  { %v1254_v48 = vadd.f32 %v1678_v46, %v1253_v47  ;;  %v1901_v49 = vpop.f32.mrb[29].mxu0 }
 0x588   :  { %v1256_v50 = vpop.f32.mrb[30].mxu0 }
 0x589   :  { %v1259_v51 = vmax.f32 %v1254_v48, 0.0  ;;  %v1902_v52 = vpop.f32.mrb[31].mxu0 }
 0x58b   :  { %v1260_v53 = vpack.c.bf16 %v1259_v51, %v1259_v51 }
 0x58d   :  { %1920 = vmatmul.mubr.bf16.vlgmr.msra.gmra.mrb[16].mxu1 %v1260_v53 }
 0x58e   :  { %1959 = vmatprep.mubr.msk.bf16.mxu1 %vm2557_vm0, %v2554_v2  ;;  %1944 = vmatpush3.bf16.msra.mxu1 %v2059_v56 }
 0x58f   :  { %1945 = vmatprep.subr.bf16.mxu1 %v2554_v2 }
 0x592   :  { %1946 = vmatpush3.bf16.msra.mxu1 %v2060_v57 }
 0x593   :  { %1947 = vmatprep.subr.bf16.mxu1 %v2554_v2 }
 0x596   :  { %1948 = vmatpush3.bf16.msra.mxu1 %v2061_v58 }
 0x597   :  { %1949 = vmatprep.subr.bf16.mxu1 %v2554_v2 }
 0x59a   :  { %1950 = vmatpush3.bf16.msra.mxu1 %v2062_v59 }
 0x59b   :  { %1951 = vmatprep.subr.bf16.mxu1 %v2554_v2 }
 0x59e   :  { %1952 = vmatpush3.bf16.msra.mxu1 %v2063_v60 }
 0x59f   :  { %1953 = vmatprep.subr.bf16.mxu1 %v2554_v2 }
 0x5a2   :  { %1954 = vmatpush3.bf16.msra.mxu1 %v2064_v61 }
 0x5a3   :  { %1955 = vmatprep.subr.bf16.mxu1 %v2554_v2 }
 0x5a6   :  { %1956 = vmatpush3.bf16.msra.mxu1 %v2065_v7 }
 0x5a7   :  { %1957 = vmatprep.subr.bf16.mxu1 %v2554_v2 }
 0x5aa   :  { %1958 = vmatpush3.bf16.msra.mxu1 %v2066_v8 }
 0x660   :  { %v1366_v63 = vpop.f32.mrb[16].mxu1 }
 0x661   :  { %v1367_v0 = vadd.f32 %v1687_v62, %v1366_v63  ;;  %v1921_v1 = vpop.f32.mrb[17].mxu1 }
 0x662   :  { %v1369_v3 = vpop.f32.mrb[18].mxu1 }
 0x663   :  { %v1372_v4 = vmax.f32 %v1367_v0, 0.0  ;;  %v1922_v5 = vpop.f32.mrb[19].mxu1 }
 0x665   :  { %v1373_v6 = vpack.c.bf16 %v1372_v4, %v1372_v4 }
 0x667   :  { %1940 = vmatmul.mubr.bf16.vlgmr.msra.gmra.mrb[32].mxu0 %v1373_v6 }
 0x73a   :  { %v1479_v10 = vpop.f32.mrb[32].mxu0 }
 0x73b   :  { %v1480_v11 = vadd.f32 %v1696_v9, %v1479_v10  ;;  %v1941_v12 = vpop.f32.mrb[33].mxu0 }
 0x73c   :  { %v1482_v13 = vpop.f32.mrb[34].mxu0 }
 0x73d   :  { %v1485_v14 = vmax.f32 %v1480_v11, 0.0  ;;  %v1942_v15 = vpop.f32.mrb[35].mxu0 }
 0x73f   :  { %v1486_v16 = vpack.c.bf16 %v1485_v14, %v1485_v14 }
 0x741   :  { %1960 = vmatmul.mubr.bf16.vlgmr.msra.gmra.mrb[20].mxu1 %v1486_v16 }
 0x814   :  { %v1592_v18 = vpop.f32.mrb[20].mxu1 }
 0x815   :  { %v1593_v19 = vadd.f32 %v1705_v17, %v1592_v18  ;;  %v1961_v20 = vpop.f32.mrb[21].mxu1 }
 0x816   :  { %v1595_v21 = vpop.f32.mrb[22].mxu1 }
 0x817   :  { %1598 = vst [vmem:[#allocation32] sm:$0xff] %v1593_v19  ;;  %v1962_v2 = vpop.f32.mrb[23].mxu1 }
 0x818   :  { %2496 = shalt.err (!%p2493_p2)
}
 0x819   :  { %s3147_s8 = sld [smem:[#allocation49_spill]] }
 0x81f   :  { %s2497_s20 = scalar_lea.hbm %s3147_s8, 128 }
 0x820   :  { %p2498_p3 = scmp.ne.s32.totalorder %s3147_s8, %s2497_s20  ;;  %p2501_p4 = scmp.lt.u32.totalorder %s2497_s20, %s3147_s8 }
 0x822   :  { %p2503_p5 = pnand %p2501_p4, %p2498_p3 }
 0x824   :  { %2506 = shalt.err (!%p2503_p5)
}
 0x825   :  { %1608 = dma.vmem_to_hbm [thread:$0]  %s1606_s13, 128, %s3147_s8, [#allocation4]  }
 0x826   :  { %2527 = dma.done.wait [#allocation4], 128  }
 0x827   :  { %2528 = vsyncadd [#allocation4], 4294967168 }
 0x828   :  { %1612 = vsyncpa [#allocation3], 1 }
 0x829   :  { %1613 = vsyncpa [#allocation6], 1 }
 0x82a   :  { %1614 = vsyncpa [#allocation9], 1 }
 0x82b   :  { %1615 = vsyncpa [#allocation12], 1 }
 0x82c   :  { %1616 = vsyncpa [#allocation15], 1 }
 0x82d   :  { %1617 = vsyncpa [#allocation18], 1 }
 0x82e   :  { %1618 = vsyncpa [#allocation21], 1 }
 0x82f   :  { %1619 = vsyncpa [#allocation24], 1 }
 0x830   :  { %1620 = vsyncpa [#allocation27], 1 }
 0x831   :  { %1621 = vsyncpa [#allocation30], 1 }
 0x832   :  { %1622 = vsyncpa [#allocation4], 1 }

</bundles_post_ra>
